<compile_context>
chip_gen: v5e
topology: v5e:2x2
jax: 0.10.0
libtpu: 0.0.40
codegen_flags: <defaults>
</compile_context>

<pallas_src>
import functools
import math

import jax
import jax.numpy as jnp
from jax.experimental import pallas as pl
from jax.experimental.pallas import tpu as pltpu


_VMEM_LIMIT = 64 * 1024 * 1024


# ----------------------------------------------------------------------------- helpers
def _round_up(x, m):
    return ((x + m - 1) // m) * m


def _pad_rows(n):
    # small graphs: single tile (block == full array); larger graphs: 256/512 tiles.
    if n <= 256:
        return _round_up(n, 8)
    if n <= 1024:
        return _round_up(n, 256)
    return _round_up(n, 512)


def _choose_tiles(n_pad):
    if n_pad <= 1024:
        return n_pad, n_pad          # one (dst, src) tile
    return 256, 512                  # dst tile (sublane), src tile (lane axis of adj)


# ----------------------------------------------------------------------------- kernels
def _linear_kernel(activation, x_ref, w_ref, b_ref, o_ref):
    y = jnp.dot(x_ref[...], w_ref[...], preferred_element_type=jnp.float32) + b_ref[...]
    if activation == "gelu":
        # TODO(synk): PyTorch F.gelu default is the exact erf-GELU; tanh approximation
        # is used for robust Mosaic lowering (max abs diff ~3e-3).
        y = jax.nn.gelu(y, approximate=True)
    o_ref[...] = y


def _hgt_attn_kernel(
    n_heads, d_head, use_norm,
    q_ref, k_ref, v_ref, adj_ref, h_ref,
    wa_ref, ba_ref, skip_ref, gamma_ref, beta_ref,
    o_ref,
    m_sc, l_sc, acc_sc,
):
    j = pl.program_id(1)

    @pl.when(j == 0)
    def _():
        m_sc[...] = jnp.full(m_sc.shape, -1e30, jnp.float32)
        l_sc[...] = jnp.zeros(l_sc.shape, jnp.float32)
        acc_sc[...] = jnp.zeros(acc_sc.shape, jnp.float32)

    q = q_ref[...]                                   # (H, TD, D); pri/sqrt(dk) folded in
    k = k_ref[...]                                   # (H, TS, D); relation_att folded in
    v = v_ref[...]                                   # (H, TS, D); relation_msg folded in

    td, ts = adj_ref.shape
    mask2d = adj_ref[...].astype(jnp.float32) > 0.0               # (TD, TS)
    mask = jnp.broadcast_to(mask2d[None, :, :], (n_heads, td, ts))

    # att[h, dst, src] = <q_eff[h, dst], k_eff[h, src]>   (batched over heads)
    att = jnp.einsum("hnd,hmd->hnm", q, k, preferred_element_type=jnp.float32)
    att = jnp.where(mask, att, -1e30)

    # online (flash-style) masked softmax over the src axis.
    m_prev = m_sc[...]
    m_new = jnp.maximum(m_prev, jnp.max(att, axis=-1, keepdims=True))
    corr = jnp.exp(m_prev - m_new)
    p = jnp.where(mask, jnp.exp(att - m_new), 0.0)                # (H, TD, TS)

    l_sc[...] = corr * l_sc[...] + jnp.sum(p, axis=-1, keepdims=True)
    acc_sc[...] = corr * acc_sc[...] + jnp.einsum(
        "hnm,hmd->hnd", p, v, preferred_element_type=jnp.float32)
    m_sc[...] = m_new

    @pl.when(j == pl.num_programs(1) - 1)
    def _():
        l = l_sc[...]
        inv = pl.reciprocal(jnp.where(l > 0.0, l, 1.0), approx=True)
        agg = acc_sc[...] * inv                                   # (H, TD, D)

        # A-linear: H small matmuls, but only once per dst tile (finalize), accumulated
        # into one lane-dense (TD, HD) result.
        wa = wa_ref[...]
        trans = jnp.dot(agg[0], wa[0:d_head, :], preferred_element_type=jnp.float32)
        for hh in range(1, n_heads):
            trans = trans + jnp.dot(
                agg[hh], wa[hh * d_head:(hh + 1) * d_head, :],
                preferred_element_type=jnp.float32)
        trans = trans + ba_ref[...]
        # TODO(synk): nn.Dropout is identity at inference; omitted.

        alpha = jax.nn.sigmoid(skip_ref[...])                     # (1, 1) broadcast
        res = trans * alpha + h_ref[...] * (1.0 - alpha)

        if use_norm:
            mean = jnp.mean(res, axis=-1, keepdims=True)
            var = jnp.mean((res - mean) ** 2, axis=-1, keepdims=True)
            res = (res - mean) * jax.lax.rsqrt(var + 1e-5)
            res = res * gamma_ref[...] + beta_ref[...]

        o_ref[...] = res


# ----------------------------------------------------------------------------- wrappers
def linear(x, w, b, *, activation=None):
    n, f_in = x.shape
    f_out = w.shape[1]
    tr = n if n <= 256 else 256
    return pl.pallas_call(
        functools.partial(_linear_kernel, activation),
        out_shape=jax.ShapeDtypeStruct((n, f_out), jnp.float32),
        grid_spec=pltpu.PrefetchScalarGridSpec(
            num_scalar_prefetch=0,
            grid=(n // tr,),
            in_specs=[
                pl.BlockSpec((tr, f_in), lambda i: (i, 0)),
                pl.BlockSpec((f_in, f_out), lambda i: (0, 0)),
                pl.BlockSpec((1, f_out), lambda i: (0, 0)),
            ],
            out_specs=pl.BlockSpec((tr, f_out), lambda i: (i, 0)),
        ),
        compiler_params=pltpu.CompilerParams(
            dimension_semantics=("parallel",),
            vmem_limit_bytes=_VMEM_LIMIT,
        ),
    )(x, w, b)


def _fold_relation(w, b, rel):
    # Effective per-head projection:  x @ w[:, sl] @ rel[h]  ==  x @ (w[:, sl] @ rel[h]).
    f = w.shape[0]
    n_heads, d, _ = rel.shape
    w_eff = jnp.einsum("fhd,hde->fhe", w.reshape(f, n_heads, d), rel)
    b_eff = jnp.einsum("hd,hde->he", b.reshape(n_heads, d), rel)
    return w_eff.reshape(f, n_heads * d), b_eff.reshape(1, n_heads * d)


def hgt_layer(h, adj, p, *, n_heads, d_head, use_norm=True):
    n_pad, hd = h.shape
    assert hd == n_heads * d_head

    # ---- fold relation_att / relation_msg / relation_pri into the projections (XLA, once).
    wk_eff, bk_eff = _fold_relation(p["wk"], p["bk"], p["ratt"])
    wv_eff, bv_eff = _fold_relation(p["wv"], p["bv"], p["rmsg"])
    scale = p["pri"].reshape(n_heads) / math.sqrt(d_head)
    wq_eff = (p["wq"].reshape(hd, n_heads, d_head) * scale[None, :, None]).reshape(hd, hd)
    bq_eff = (p["bq"].reshape(n_heads, d_head) * scale[:, None]).reshape(1, hd)

    wkqv = jnp.concatenate([wk_eff, wq_eff, wv_eff], axis=1)     # (HD, 3*HD)
    bkqv = jnp.concatenate([bk_eff, bq_eff, bv_eff], axis=1)     # (1, 3*HD)

    # ---- one fused lane-dense K/Q/V projection, then head-major layout for the kernel.
    kqv = linear(h, wkqv, bkqv)                                  # (N_pad, 3*HD)
    kqv = kqv.reshape(n_pad, 3, n_heads, d_head).transpose(1, 2, 0, 3)  # (3, H, N, D)
    k3, q3, v3 = kqv[0], kqv[1], kqv[2]

    td, ts = _choose_tiles(n_pad)
    grid = (n_pad // td, n_pad // ts)
    kern = functools.partial(_hgt_attn_kernel, n_heads, d_head, use_norm)
    return pl.pallas_call(
        kern,
        out_shape=jax.ShapeDtypeStruct((n_pad, hd), jnp.float32),
        grid_spec=pltpu.PrefetchScalarGridSpec(
            num_scalar_prefetch=0,
            grid=grid,
            in_specs=[
                pl.BlockSpec((n_heads, td, d_head), lambda i, j: (0, i, 0)),  # q
                pl.BlockSpec((n_heads, ts, d_head), lambda i, j: (0, j, 0)),  # k
                pl.BlockSpec((n_heads, ts, d_head), lambda i, j: (0, j, 0)),  # v
                pl.BlockSpec((td, ts), lambda i, j: (i, j)),                  # adj (bf16)
                pl.BlockSpec((td, hd), lambda i, j: (i, 0)),                  # h (residual)
                pl.BlockSpec((hd, hd), lambda i, j: (0, 0)),                  # wa
                pl.BlockSpec((1, hd), lambda i, j: (0, 0)),                   # ba
                pl.BlockSpec((1, 1), lambda i, j: (0, 0)),                    # skip
                pl.BlockSpec((1, hd), lambda i, j: (0, 0)),                   # gamma
                pl.BlockSpec((1, hd), lambda i, j: (0, 0)),                   # beta
            ],
            out_specs=pl.BlockSpec((td, hd), lambda i, j: (i, 0)),
            scratch_shapes=[
                pltpu.VMEM((n_heads, td, 1), jnp.float32),        # running max
                pltpu.VMEM((n_heads, td, 1), jnp.float32),        # running denom
                pltpu.VMEM((n_heads, td, d_head), jnp.float32),   # running acc
            ],
        ),
        compiler_params=pltpu.CompilerParams(
            dimension_semantics=("parallel", "arbitrary"),
            vmem_limit_bytes=_VMEM_LIMIT,
        ),
    )(q3, k3, v3, adj, h, p["wa"], p["ba"], p["skip"], p["gamma"], p["beta"])


@functools.partial(jax.jit, static_argnames=("n_heads", "n_hid"))
def hgt_forward(params, feat, adj_ds, *, n_heads, n_hid):
    n = feat.shape[0]
    n_pad = _pad_rows(n)
    feat_p = jnp.pad(feat, ((0, n_pad - n), (0, 0)))
    # adjacency as bf16 (0/1 is exact) to halve its O(N^2) HBM traffic.
    adj_p = jnp.pad(adj_ds, ((0, n_pad - n), (0, n_pad - n))).astype(jnp.bfloat16)

    # h = gelu(adapt_ws(h))
    h = linear(feat_p, params["adapt_w"], params["adapt_b"], activation="gelu")
    # n_layers x HGTLayer
    for lp in params["layers"]:
        h = hgt_layer(h, adj_p, lp, n_heads=n_heads, d_head=n_hid, use_norm=True)
    # out linear
    out = linear(h, params["out_w"], params["out_b"])
    return out[:n]


# ----------------------------------------------------------------------------- params
def init_params(key, n_inp, n_hid, n_out, n_layers, n_heads):
    hd = n_hid * n_heads
    keys = jax.random.split(key, 2 + 6 * n_layers)
    ki = iter(keys)

    def nrm(k, shape, fan_in):
        return (jax.random.normal(k, shape, jnp.float32) / math.sqrt(fan_in)).astype(jnp.float32)

    params = {
        "adapt_w": nrm(next(ki), (n_inp, hd), n_inp),
        "adapt_b": jnp.zeros((1, hd), jnp.float32),
        "out_w": nrm(next(ki), (hd, n_out), hd),
        "out_b": jnp.zeros((1, n_out), jnp.float32),
        "layers": [],
    }
    for _layer in range(n_layers):
        lp = {
            "wk": nrm(next(ki), (hd, hd), hd), "bk": jnp.zeros((1, hd), jnp.float32),
            "wq": nrm(next(ki), (hd, hd), hd), "bq": jnp.zeros((1, hd), jnp.float32),
            "wv": nrm(next(ki), (hd, hd), hd), "bv": jnp.zeros((1, hd), jnp.float32),
            "wa": nrm(next(ki), (hd, hd), hd), "ba": jnp.zeros((1, hd), jnp.float32),
            "ratt": nrm(next(ki), (n_heads, n_hid, n_hid), n_hid),
            "rmsg": nrm(next(ki), (n_heads, n_hid, n_hid), n_hid),
            "pri": jnp.ones((1, n_heads), jnp.float32),      # relation_pri init = 1
            "skip": jnp.ones((1, 1), jnp.float32),           # skip param init = 1
            "gamma": jnp.ones((1, hd), jnp.float32),
            "beta": jnp.zeros((1, hd), jnp.float32),
        }
        params["layers"].append(lp)
    return params


# ----------------------------------------------------------------------------- main
if __name__ == "__main__":
    N, n_inp, n_hid, n_out, n_layers, n_heads = 16, 8, 8, 4, 2, 4

    key = jax.random.PRNGKey(0)
    k_feat, k_adj, k_par = jax.random.split(key, 3)

    feat = jax.random.normal(k_feat, (N, n_inp), jnp.float32)
    # adjacency: adj_ds[dst, src] = 1.0 iff edge src -> dst; self-loops guarantee >=1 in-edge.
    adj_ds = (jax.random.uniform(k_adj, (N, N)) < 0.3).astype(jnp.float32)
    adj_ds = jnp.maximum(adj_ds, jnp.eye(N, dtype=jnp.float32))

    params = init_params(k_par, n_inp, n_hid, n_out, n_layers, n_heads)

    out = hgt_forward(params, feat, adj_ds, n_heads=n_heads, n_hid=n_hid)
    out = jax.block_until_ready(out)
    assert out.shape == (N, n_out) and out.dtype == jnp.float32
    assert bool(jnp.all(jnp.isfinite(out)))
    print("KERNEL_OK")
</pallas_src>

<mosaic_0001>
module attributes {stable_mosaic.version = 11 : i64} {
  func.func @_linear_kernel(%arg0: i32, %arg1: memref<16x32xf32, #tpu.memory_space<vmem>>, %arg2: memref<32x96xf32, #tpu.memory_space<vmem>>, %arg3: memref<1x96xf32, #tpu.memory_space<vmem>>, %arg4: memref<16x96xf32, #tpu.memory_space<vmem>>) attributes {dimension_semantics = [#tpu.dimension_semantics<parallel>], iteration_bounds = array<i64: 1>, scalar_prefetch = 0 : i64, scratch_operands = 0 : i64, tpu.core_type = #tpu.core_type<tc>, window_params = [{transform_indices = @transform_0, window_bounds = array<i64: 16, 32>}, {pipeline_mode = #tpu.pipeline_mode<synchronous>, transform_indices = @transform_1, window_bounds = array<i64: 32, 96>}, {pipeline_mode = #tpu.pipeline_mode<synchronous>, transform_indices = @transform_2, window_bounds = array<i64: 1, 96>}, {transform_indices = @transform_3, window_bounds = array<i64: 16, 96>}]} {
    %c0 = arith.constant 0 : index
    %c0_0 = arith.constant 0 : index
    %0 = vector.load %arg1[%c0, %c0_0] : memref<16x32xf32, #tpu.memory_space<vmem>>, vector<16x32xf32>
    %c0_1 = arith.constant 0 : index
    %c0_2 = arith.constant 0 : index
    %1 = vector.load %arg2[%c0_1, %c0_2] : memref<32x96xf32, #tpu.memory_space<vmem>>, vector<32x96xf32>
    %cst = arith.constant dense<0.000000e+00> : vector<16x96xf32>
    %2 = tpu.matmul %0, %1, %cst {dimension_numbers = #tpu.dot_dimension_numbers<[1], [0], [0], [1], [0, 0, 1, 1], [], []>} : vector<16x32xf32>, vector<32x96xf32>, vector<16x96xf32> -> vector<16x96xf32>
    %c0_3 = arith.constant 0 : index
    %c0_4 = arith.constant 0 : index
    %3 = vector.load %arg3[%c0_3, %c0_4] : memref<1x96xf32, #tpu.memory_space<vmem>>, vector<1x96xf32>
    %4 = vector.broadcast %3 : vector<1x96xf32> to vector<16x96xf32>
    %5 = arith.addf %2, %4 : vector<16x96xf32>
    %c0_5 = arith.constant 0 : index
    %c0_6 = arith.constant 0 : index
    %6 = vector.load %arg4[%c0_5, %c0_6] : memref<16x96xf32, #tpu.memory_space<vmem>>, vector<16x96xf32>
    tpu.vector_store %arg4[%c0_5, %c0_6], %5 {strides = array<i32>} : memref<16x96xf32, #tpu.memory_space<vmem>>, vector<16x96xf32>,
    return
  }
  func.func @transform_0(%arg0: i32) -> (i32, i32) {
    %c0_i32 = arith.constant 0 : i32
    %c0_i32_0 = arith.constant 0 : i32
    return %arg0, %c0_i32 : i32, i32
  }
  func.func @transform_1(%arg0: i32) -> (i32, i32) {
    %c0_i32 = arith.constant 0 : i32
    %c0_i32_0 = arith.constant 0 : i32
    %c0_i32_1 = arith.constant 0 : i32
    return %c0_i32, %c0_i32_0 : i32, i32
  }
  func.func @transform_2(%arg0: i32) -> (i32, i32) {
    %c0_i32 = arith.constant 0 : i32
    %c0_i32_0 = arith.constant 0 : i32
    %c0_i32_1 = arith.constant 0 : i32
    return %c0_i32, %c0_i32_0 : i32, i32
  }
  func.func @transform_3(%arg0: i32) -> (i32, i32) {
    %c0_i32 = arith.constant 0 : i32
    %c0_i32_0 = arith.constant 0 : i32
    return %arg0, %c0_i32 : i32, i32
  }
}

module attributes {stable_mosaic.version = 11 : i64} {
  func.func @_linear_kernel(%arg0: i32, %arg1: memref<16x8xf32, #tpu.memory_space<vmem>>, %arg2: memref<8x32xf32, #tpu.memory_space<vmem>>, %arg3: memref<1x32xf32, #tpu.memory_space<vmem>>, %arg4: memref<16x32xf32, #tpu.memory_space<vmem>>) attributes {dimension_semantics = [#tpu.dimension_semantics<parallel>], iteration_bounds = array<i64: 1>, scalar_prefetch = 0 : i64, scratch_operands = 0 : i64, tpu.core_type = #tpu.core_type<tc>, window_params = [{transform_indices = @transform_0, window_bounds = array<i64: 16, 8>}, {pipeline_mode = #tpu.pipeline_mode<synchronous>, transform_indices = @transform_1, window_bounds = array<i64: 8, 32>}, {pipeline_mode = #tpu.pipeline_mode<synchronous>, transform_indices = @transform_2, window_bounds = array<i64: 1, 32>}, {transform_indices = @transform_3, window_bounds = array<i64: 16, 32>}]} {
    %c0 = arith.constant 0 : index
    %c0_0 = arith.constant 0 : index
    %0 = vector.load %arg1[%c0, %c0_0] : memref<16x8xf32, #tpu.memory_space<vmem>>, vector<16x8xf32>
    %c0_1 = arith.constant 0 : index
    %c0_2 = arith.constant 0 : index
    %1 = vector.load %arg2[%c0_1, %c0_2] : memref<8x32xf32, #tpu.memory_space<vmem>>, vector<8x32xf32>
    %cst = arith.constant dense<0.000000e+00> : vector<16x32xf32>
    %2 = tpu.matmul %0, %1, %cst {dimension_numbers = #tpu.dot_dimension_numbers<[1], [0], [0], [1], [0, 0, 1, 1], [], []>} : vector<16x8xf32>, vector<8x32xf32>, vector<16x32xf32> -> vector<16x32xf32>
    %c0_3 = arith.constant 0 : index
    %c0_4 = arith.constant 0 : index
    %3 = vector.load %arg3[%c0_3, %c0_4] : memref<1x32xf32, #tpu.memory_space<vmem>>, vector<1x32xf32>
    %4 = vector.broadcast %3 : vector<1x32xf32> to vector<16x32xf32>
    %5 = arith.addf %2, %4 : vector<16x32xf32>
    %6 = arith.mulf %5, %5 : vector<16x32xf32>
    %7 = arith.mulf %5, %6 : vector<16x32xf32>
    %cst_5 = arith.constant 4.471500e-02 : f32
    %8 = vector.broadcast %cst_5 : f32 to vector<16x32xf32>
    %9 = arith.mulf %8, %7 : vector<16x32xf32>
    %10 = arith.addf %5, %9 : vector<16x32xf32>
    %cst_6 = arith.constant 0.797884583 : f32
    %11 = vector.broadcast %cst_6 : f32 to vector<16x32xf32>
    %12 = arith.mulf %11, %10 : vector<16x32xf32>
    %13 = math.tanh %12 : vector<16x32xf32>
    %cst_7 = arith.constant 1.000000e+00 : f32
    %14 = vector.broadcast %cst_7 : f32 to vector<16x32xf32>
    %15 = arith.addf %14, %13 : vector<16x32xf32>
    %cst_8 = arith.constant 5.000000e-01 : f32
    %16 = vector.broadcast %cst_8 : f32 to vector<16x32xf32>
    %17 = arith.mulf %16, %15 : vector<16x32xf32>
    %18 = arith.mulf %5, %17 : vector<16x32xf32>
    %c0_9 = arith.constant 0 : index
    %c0_10 = arith.constant 0 : index
    %19 = vector.load %arg4[%c0_9, %c0_10] : memref<16x32xf32, #tpu.memory_space<vmem>>, vector<16x32xf32>
    tpu.vector_store %arg4[%c0_9, %c0_10], %18 {strides = array<i32>} : memref<16x32xf32, #tpu.memory_space<vmem>>, vector<16x32xf32>,
    return
  }
  func.func @transform_0(%arg0: i32) -> (i32, i32) {
    %c0_i32 = arith.constant 0 : i32
    %c0_i32_0 = arith.constant 0 : i32
    return %arg0, %c0_i32 : i32, i32
  }
  func.func @transform_1(%arg0: i32) -> (i32, i32) {
    %c0_i32 = arith.constant 0 : i32
    %c0_i32_0 = arith.constant 0 : i32
    %c0_i32_1 = arith.constant 0 : i32
    return %c0_i32, %c0_i32_0 : i32, i32
  }
  func.func @transform_2(%arg0: i32) -> (i32, i32) {
    %c0_i32 = arith.constant 0 : i32
    %c0_i32_0 = arith.constant 0 : i32
    %c0_i32_1 = arith.constant 0 : i32
    return %c0_i32, %c0_i32_0 : i32, i32
  }
  func.func @transform_3(%arg0: i32) -> (i32, i32) {
    %c0_i32 = arith.constant 0 : i32
    %c0_i32_0 = arith.constant 0 : i32
    return %arg0, %c0_i32 : i32, i32
  }
}

module attributes {stable_mosaic.version = 11 : i64} {
  func.func @_linear_kernel(%arg0: i32, %arg1: memref<16x32xf32, #tpu.memory_space<vmem>>, %arg2: memref<32x4xf32, #tpu.memory_space<vmem>>, %arg3: memref<1x4xf32, #tpu.memory_space<vmem>>, %arg4: memref<16x4xf32, #tpu.memory_space<vmem>>) attributes {dimension_semantics = [#tpu.dimension_semantics<parallel>], iteration_bounds = array<i64: 1>, scalar_prefetch = 0 : i64, scratch_operands = 0 : i64, tpu.core_type = #tpu.core_type<tc>, window_params = [{transform_indices = @transform_0, window_bounds = array<i64: 16, 32>}, {pipeline_mode = #tpu.pipeline_mode<synchronous>, transform_indices = @transform_1, window_bounds = array<i64: 32, 4>}, {pipeline_mode = #tpu.pipeline_mode<synchronous>, transform_indices = @transform_2, window_bounds = array<i64: 1, 4>}, {transform_indices = @transform_3, window_bounds = array<i64: 16, 4>}]} {
    %c0 = arith.constant 0 : index
    %c0_0 = arith.constant 0 : index
    %0 = vector.load %arg1[%c0, %c0_0] : memref<16x32xf32, #tpu.memory_space<vmem>>, vector<16x32xf32>
    %c0_1 = arith.constant 0 : index
    %c0_2 = arith.constant 0 : index
    %1 = vector.load %arg2[%c0_1, %c0_2] : memref<32x4xf32, #tpu.memory_space<vmem>>, vector<32x4xf32>
    %cst = arith.constant dense<0.000000e+00> : vector<16x4xf32>
    %2 = tpu.matmul %0, %1, %cst {dimension_numbers = #tpu.dot_dimension_numbers<[1], [0], [0], [1], [0, 0, 1, 1], [], []>} : vector<16x32xf32>, vector<32x4xf32>, vector<16x4xf32> -> vector<16x4xf32>
    %c0_3 = arith.constant 0 : index
    %c0_4 = arith.constant 0 : index
    %3 = vector.load %arg3[%c0_3, %c0_4] : memref<1x4xf32, #tpu.memory_space<vmem>>, vector<1x4xf32>
    %4 = vector.broadcast %3 : vector<1x4xf32> to vector<16x4xf32>
    %5 = arith.addf %2, %4 : vector<16x4xf32>
    %c0_5 = arith.constant 0 : index
    %c0_6 = arith.constant 0 : index
    %6 = vector.load %arg4[%c0_5, %c0_6] : memref<16x4xf32, #tpu.memory_space<vmem>>, vector<16x4xf32>
    tpu.vector_store %arg4[%c0_5, %c0_6], %5 {strides = array<i32>} : memref<16x4xf32, #tpu.memory_space<vmem>>, vector<16x4xf32>,
    return
  }
  func.func @transform_0(%arg0: i32) -> (i32, i32) {
    %c0_i32 = arith.constant 0 : i32
    %c0_i32_0 = arith.constant 0 : i32
    return %arg0, %c0_i32 : i32, i32
  }
  func.func @transform_1(%arg0: i32) -> (i32, i32) {
    %c0_i32 = arith.constant 0 : i32
    %c0_i32_0 = arith.constant 0 : i32
    %c0_i32_1 = arith.constant 0 : i32
    return %c0_i32, %c0_i32_0 : i32, i32
  }
  func.func @transform_2(%arg0: i32) -> (i32, i32) {
    %c0_i32 = arith.constant 0 : i32
    %c0_i32_0 = arith.constant 0 : i32
    %c0_i32_1 = arith.constant 0 : i32
    return %c0_i32, %c0_i32_0 : i32, i32
  }
  func.func @transform_3(%arg0: i32) -> (i32, i32) {
    %c0_i32 = arith.constant 0 : i32
    %c0_i32_0 = arith.constant 0 : i32
    return %arg0, %c0_i32 : i32, i32
  }
}

module attributes {stable_mosaic.version = 11 : i64} {
  func.func @_hgt_attn_kernel(%arg0: i32, %arg1: i32, %arg2: memref<4x16x8xf32, #tpu.memory_space<vmem>>, %arg3: memref<4x16x8xf32, #tpu.memory_space<vmem>>, %arg4: memref<4x16x8xf32, #tpu.memory_space<vmem>>, %arg5: memref<16x16xbf16, #tpu.memory_space<vmem>>, %arg6: memref<16x32xf32, #tpu.memory_space<vmem>>, %arg7: memref<32x32xf32, #tpu.memory_space<vmem>>, %arg8: memref<1x32xf32, #tpu.memory_space<vmem>>, %arg9: memref<1x1xf32, #tpu.memory_space<vmem>>, %arg10: memref<1x32xf32, #tpu.memory_space<vmem>>, %arg11: memref<1x32xf32, #tpu.memory_space<vmem>>, %arg12: memref<16x32xf32, #tpu.memory_space<vmem>>, %arg13: memref<4x16x1xf32, #tpu.memory_space<vmem>>, %arg14: memref<4x16x1xf32, #tpu.memory_space<vmem>>, %arg15: memref<4x16x8xf32, #tpu.memory_space<vmem>>) attributes {dimension_semantics = [#tpu.dimension_semantics<parallel>, #tpu.dimension_semantics<arbitrary>], iteration_bounds = array<i64: 1, 1>, scalar_prefetch = 0 : i64, scratch_operands = 3 : i64, tpu.core_type = #tpu.core_type<tc>, window_params = [{transform_indices = @transform_0, window_bounds = array<i64: 4, 16, 8>}, {transform_indices = @transform_1, window_bounds = array<i64: 4, 16, 8>}, {transform_indices = @transform_2, window_bounds = array<i64: 4, 16, 8>}, {transform_indices = @transform_3, window_bounds = array<i64: 16, 16>}, {transform_indices = @transform_4, window_bounds = array<i64: 16, 32>}, {pipeline_mode = #tpu.pipeline_mode<synchronous>, transform_indices = @transform_5, window_bounds = array<i64: 32, 32>}, {pipeline_mode = #tpu.pipeline_mode<synchronous>, transform_indices = @transform_6, window_bounds = array<i64: 1, 32>}, {pipeline_mode = #tpu.pipeline_mode<synchronous>, transform_indices = @transform_7, window_bounds = array<i64: 1, 1>}, {pipeline_mode = #tpu.pipeline_mode<synchronous>, transform_indices = @transform_8, window_bounds = array<i64: 1, 32>}, {pipeline_mode = #tpu.pipeline_mode<synchronous>, transform_indices = @transform_9, window_bounds = array<i64: 1, 32>}, {transform_indices = @transform_10, window_bounds = array<i64: 16, 32>}]} {
    %c0_i32 = arith.constant 0 : i32
    %0 = arith.cmpi eq, %arg1, %c0_i32 : i32
    %1 = arith.extui %0 : i1 to i32
    %c0_i32_0 = arith.constant 0 : i32
    %2 = arith.cmpi ne, %1, %c0_i32_0 : i32
    scf.if %2 {
      %cst_37 = arith.constant -1.000000e+30 : f32
      %43 = vector.broadcast %cst_37 : f32 to vector<4x16x1xf32>
      %c0_38 = arith.constant 0 : index
      %c0_39 = arith.constant 0 : index
      %c0_40 = arith.constant 0 : index
      %44 = vector.load %arg13[%c0_38, %c0_39, %c0_40] : memref<4x16x1xf32, #tpu.memory_space<vmem>>, vector<4x16x1xf32>
      tpu.vector_store %arg13[%c0_38, %c0_39, %c0_40], %43 {strides = array<i32>} : memref<4x16x1xf32, #tpu.memory_space<vmem>>, vector<4x16x1xf32>,
      %cst_41 = arith.constant 0.000000e+00 : f32
      %45 = vector.broadcast %cst_41 : f32 to vector<4x16x1xf32>
      %c0_42 = arith.constant 0 : index
      %c0_43 = arith.constant 0 : index
      %c0_44 = arith.constant 0 : index
      %46 = vector.load %arg14[%c0_42, %c0_43, %c0_44] : memref<4x16x1xf32, #tpu.memory_space<vmem>>, vector<4x16x1xf32>
      tpu.vector_store %arg14[%c0_42, %c0_43, %c0_44], %45 {strides = array<i32>} : memref<4x16x1xf32, #tpu.memory_space<vmem>>, vector<4x16x1xf32>,
      %cst_45 = arith.constant 0.000000e+00 : f32
      %47 = vector.broadcast %cst_45 : f32 to vector<4x16x8xf32>
      %c0_46 = arith.constant 0 : index
      %c0_47 = arith.constant 0 : index
      %c0_48 = arith.constant 0 : index
      %48 = vector.load %arg15[%c0_46, %c0_47, %c0_48] : memref<4x16x8xf32, #tpu.memory_space<vmem>>, vector<4x16x8xf32>
      tpu.vector_store %arg15[%c0_46, %c0_47, %c0_48], %47 {strides = array<i32>} : memref<4x16x8xf32, #tpu.memory_space<vmem>>, vector<4x16x8xf32>,
    } else {
    }
    %c0 = arith.constant 0 : index
    %c0_1 = arith.constant 0 : index
    %c0_2 = arith.constant 0 : index
    %3 = vector.load %arg2[%c0, %c0_1, %c0_2] : memref<4x16x8xf32, #tpu.memory_space<vmem>>, vector<4x16x8xf32>
    %c0_3 = arith.constant 0 : index
    %c0_4 = arith.constant 0 : index
    %c0_5 = arith.constant 0 : index
    %4 = vector.load %arg3[%c0_3, %c0_4, %c0_5] : memref<4x16x8xf32, #tpu.memory_space<vmem>>, vector<4x16x8xf32>
    %c0_6 = arith.constant 0 : index
    %c0_7 = arith.constant 0 : index
    %c0_8 = arith.constant 0 : index
    %5 = vector.load %arg4[%c0_6, %c0_7, %c0_8] : memref<4x16x8xf32, #tpu.memory_space<vmem>>, vector<4x16x8xf32>
    %c0_9 = arith.constant 0 : index
    %c0_10 = arith.constant 0 : index
    %6 = vector.load %arg5[%c0_9, %c0_10] : memref<16x16xbf16, #tpu.memory_space<vmem>>, vector<16x16xbf16>
    %7 = arith.extf %6 : vector<16x16xbf16> to vector<16x16xf32>
    %cst = arith.constant 0.000000e+00 : f32
    %8 = vector.broadcast %cst : f32 to vector<16x16xf32>
    %9 = arith.cmpf ogt, %7, %8 : vector<16x16xf32>
    %10 = vector.shape_cast %9 : vector<16x16xi1> to vector<1x16x16xi1>
    %11 = vector.shape_cast %10 : vector<1x16x16xi1> to vector<1x16x16xi1>
    %12 = vector.broadcast %11 : vector<1x16x16xi1> to vector<4x16x16xi1>
    "tpu.trace_start"() <{level = 10 : i32, message = "hnd,hmd->hnm"}> : () -> ()
    %cst_11 = arith.constant dense<0.000000e+00> : vector<4x16x16xf32>
    %13 = tpu.matmul %3, %4, %cst_11 {dimension_numbers = #tpu.dot_dimension_numbers<[2], [2], [1], [1], [0, 0, 0, 1, 1, 1], [0], [0]>} : vector<4x16x8xf32>, vector<4x16x8xf32>, vector<4x16x16xf32> -> vector<4x16x16xf32>
    %cst_12 = arith.constant -1.000000e+30 : f32
    "tpu.trace_stop"() : () -> ()
    %14 = vector.broadcast %cst_12 : f32 to vector<4x16x16xf32>
    %15 = arith.select %12, %13, %14 : vector<4x16x16xi1>, vector<4x16x16xf32>
    %c0_13 = arith.constant 0 : index
    %c0_14 = arith.constant 0 : index
    %c0_15 = arith.constant 0 : index
    %16 = vector.load %arg13[%c0_13, %c0_14, %c0_15] : memref<4x16x1xf32, #tpu.memory_space<vmem>>, vector<4x16x1xf32>
    %cst_16 = arith.constant dense<0xFF800000> : vector<4x16xf32>
    %17 = vector.multi_reduction <maximumf>, %15, %cst_16 [2] : vector<4x16x16xf32> to vector<4x16xf32>
    %18 = vector.shape_cast %17 : vector<4x16xf32> to vector<4x16x1xf32>
    %19 = arith.maximumf %16, %18 : vector<4x16x1xf32>
    %20 = arith.subf %16, %19 : vector<4x16x1xf32>
    %21 = math.exp %20 : vector<4x16x1xf32>
    %22 = vector.broadcast %19 : vector<4x16x1xf32> to vector<4x16x16xf32>
    %23 = arith.subf %15, %22 : vector<4x16x16xf32>
    %24 = math.exp %23 : vector<4x16x16xf32>
    %cst_17 = arith.constant 0.000000e+00 : f32
    %25 = vector.broadcast %cst_17 : f32 to vector<4x16x16xf32>
    %26 = arith.select %12, %24, %25 : vector<4x16x16xi1>, vector<4x16x16xf32>
    %c0_18 = arith.constant 0 : index
    %c0_19 = arith.constant 0 : index
    %c0_20 = arith.constant 0 : index
    %27 = vector.load %arg14[%c0_18, %c0_19, %c0_20] : memref<4x16x1xf32, #tpu.memory_space<vmem>>, vector<4x16x1xf32>
    %28 = arith.mulf %21, %27 : vector<4x16x1xf32>
    %cst_21 = arith.constant dense<0.000000e+00> : vector<4x16xf32>
    %29 = vector.multi_reduction <add>, %26, %cst_21 [2] : vector<4x16x16xf32> to vector<4x16xf32>
    %30 = vector.shape_cast %29 : vector<4x16xf32> to vector<4x16x1xf32>
    %31 = arith.addf %28, %30 : vector<4x16x1xf32>
    %c0_22 = arith.constant 0 : index
    %c0_23 = arith.constant 0 : index
    %c0_24 = arith.constant 0 : index
    %32 = vector.load %arg14[%c0_22, %c0_23, %c0_24] : memref<4x16x1xf32, #tpu.memory_space<vmem>>, vector<4x16x1xf32>
    tpu.vector_store %arg14[%c0_22, %c0_23, %c0_24], %31 {strides = array<i32>} : memref<4x16x1xf32, #tpu.memory_space<vmem>>, vector<4x16x1xf32>,
    %c0_25 = arith.constant 0 : index
    %c0_26 = arith.constant 0 : index
    %c0_27 = arith.constant 0 : index
    %33 = vector.load %arg15[%c0_25, %c0_26, %c0_27] : memref<4x16x8xf32, #tpu.memory_space<vmem>>, vector<4x16x8xf32>
    %34 = vector.broadcast %21 : vector<4x16x1xf32> to vector<4x16x8xf32>
    %35 = arith.mulf %34, %33 : vector<4x16x8xf32>
    "tpu.trace_start"() <{level = 10 : i32, message = "hnm,hmd->hnd"}> : () -> ()
    %cst_28 = arith.constant dense<0.000000e+00> : vector<4x16x8xf32>
    %36 = tpu.matmul %26, %5, %cst_28 {dimension_numbers = #tpu.dot_dimension_numbers<[2], [1], [1], [2], [0, 0, 0, 1, 1, 2], [0], [0]>} : vector<4x16x16xf32>, vector<4x16x8xf32>, vector<4x16x8xf32> -> vector<4x16x8xf32>
    "tpu.trace_stop"() : () -> ()
    %37 = arith.addf %35, %36 : vector<4x16x8xf32>
    %c0_29 = arith.constant 0 : index
    %c0_30 = arith.constant 0 : index
    %c0_31 = arith.constant 0 : index
    %38 = vector.load %arg15[%c0_29, %c0_30, %c0_31] : memref<4x16x8xf32, #tpu.memory_space<vmem>>, vector<4x16x8xf32>
    tpu.vector_store %arg15[%c0_29, %c0_30, %c0_31], %37 {strides = array<i32>} : memref<4x16x8xf32, #tpu.memory_space<vmem>>, vector<4x16x8xf32>,
    %c0_32 = arith.constant 0 : index
    %c0_33 = arith.constant 0 : index
    %c0_34 = arith.constant 0 : index
    %39 = vector.load %arg13[%c0_32, %c0_33, %c0_34] : memref<4x16x1xf32, #tpu.memory_space<vmem>>, vector<4x16x1xf32>
    tpu.vector_store %arg13[%c0_32, %c0_33, %c0_34], %19 {strides = array<i32>} : memref<4x16x1xf32, #tpu.memory_space<vmem>>, vector<4x16x1xf32>,
    %c0_i32_35 = arith.constant 0 : i32
    %40 = arith.cmpi eq, %arg1, %c0_i32_35 : i32
    %41 = arith.extui %40 : i1 to i32
    %c0_i32_36 = arith.constant 0 : i32
    %42 = arith.cmpi ne, %41, %c0_i32_36 : i32
    scf.if %42 {
      %c0_37 = arith.constant 0 : index
      %c0_38 = arith.constant 0 : index
      %c0_39 = arith.constant 0 : index
      %43 = vector.load %arg14[%c0_37, %c0_38, %c0_39] : memref<4x16x1xf32, #tpu.memory_space<vmem>>, vector<4x16x1xf32>
      %cst_40 = arith.constant 0.000000e+00 : f32
      %44 = vector.broadcast %cst_40 : f32 to vector<4x16x1xf32>
      %45 = arith.cmpf ogt, %43, %44 : vector<4x16x1xf32>
      %cst_41 = arith.constant 1.000000e+00 : f32
      %46 = vector.broadcast %cst_41 : f32 to vector<4x16x1xf32>
      %47 = arith.select %45, %43, %46 : vector<4x16x1xi1>, vector<4x16x1xf32>
      %48 = tpu.reciprocal %47 {approx = true} : vector<4x16x1xf32> -> vector<4x16x1xf32>
      %c0_42 = arith.constant 0 : index
      %c0_43 = arith.constant 0 : index
      %c0_44 = arith.constant 0 : index
      %49 = vector.load %arg15[%c0_42, %c0_43, %c0_44] : memref<4x16x8xf32, #tpu.memory_space<vmem>>, vector<4x16x8xf32>
      %50 = vector.broadcast %48 : vector<4x16x1xf32> to vector<4x16x8xf32>
      %51 = arith.mulf %49, %50 : vector<4x16x8xf32>
      %c0_45 = arith.constant 0 : index
      %c0_46 = arith.constant 0 : index
      %52 = vector.load %arg7[%c0_45, %c0_46] : memref<32x32xf32, #tpu.memory_space<vmem>>, vector<32x32xf32>
      %53 = vector.extract_strided_slice %51 {offsets = [0, 0, 0], sizes = [1, 16, 8], strides = [1, 1, 1]} : vector<4x16x8xf32> to vector<1x16x8xf32>
      %54 = vector.shape_cast %53 : vector<1x16x8xf32> to vector<16x8xf32>
      %55 = vector.extract_strided_slice %52 {offsets = [0, 0], sizes = [8, 32], strides = [1, 1]} : vector<32x32xf32> to vector<8x32xf32>
      %cst_47 = arith.constant dense<0.000000e+00> : vector<16x32xf32>
      %56 = tpu.matmul %54, %55, %cst_47 {dimension_numbers = #tpu.dot_dimension_numbers<[1], [0], [0], [1], [0, 0, 1, 1], [], []>} : vector<16x8xf32>, vector<8x32xf32>, vector<16x32xf32> -> vector<16x32xf32>
      %57 = vector.extract_strided_slice %51 {offsets = [1, 0, 0], sizes = [1, 16, 8], strides = [1, 1, 1]} : vector<4x16x8xf32> to vector<1x16x8xf32>
      %58 = vector.shape_cast %57 : vector<1x16x8xf32> to vector<16x8xf32>
      %59 = vector.extract_strided_slice %52 {offsets = [8, 0], sizes = [8, 32], strides = [1, 1]} : vector<32x32xf32> to vector<8x32xf32>
      %cst_48 = arith.constant dense<0.000000e+00> : vector<16x32xf32>
      %60 = tpu.matmul %58, %59, %cst_48 {dimension_numbers = #tpu.dot_dimension_numbers<[1], [0], [0], [1], [0, 0, 1, 1], [], []>} : vector<16x8xf32>, vector<8x32xf32>, vector<16x32xf32> -> vector<16x32xf32>
      %61 = arith.addf %56, %60 : vector<16x32xf32>
      %62 = vector.extract_strided_slice %51 {offsets = [2, 0, 0], sizes = [1, 16, 8], strides = [1, 1, 1]} : vector<4x16x8xf32> to vector<1x16x8xf32>
      %63 = vector.shape_cast %62 : vector<1x16x8xf32> to vector<16x8xf32>
      %64 = vector.extract_strided_slice %52 {offsets = [16, 0], sizes = [8, 32], strides = [1, 1]} : vector<32x32xf32> to vector<8x32xf32>
      %cst_49 = arith.constant dense<0.000000e+00> : vector<16x32xf32>
      %65 = tpu.matmul %63, %64, %cst_49 {dimension_numbers = #tpu.dot_dimension_numbers<[1], [0], [0], [1], [0, 0, 1, 1], [], []>} : vector<16x8xf32>, vector<8x32xf32>, vector<16x32xf32> -> vector<16x32xf32>
      %66 = arith.addf %61, %65 : vector<16x32xf32>
      %67 = vector.extract_strided_slice %51 {offsets = [3, 0, 0], sizes = [1, 16, 8], strides = [1, 1, 1]} : vector<4x16x8xf32> to vector<1x16x8xf32>
      %68 = vector.shape_cast %67 : vector<1x16x8xf32> to vector<16x8xf32>
      %69 = vector.extract_strided_slice %52 {offsets = [24, 0], sizes = [8, 32], strides = [1, 1]} : vector<32x32xf32> to vector<8x32xf32>
      %cst_50 = arith.constant dense<0.000000e+00> : vector<16x32xf32>
      %70 = tpu.matmul %68, %69, %cst_50 {dimension_numbers = #tpu.dot_dimension_numbers<[1], [0], [0], [1], [0, 0, 1, 1], [], []>} : vector<16x8xf32>, vector<8x32xf32>, vector<16x32xf32> -> vector<16x32xf32>
      %71 = arith.addf %66, %70 : vector<16x32xf32>
      %c0_51 = arith.constant 0 : index
      %c0_52 = arith.constant 0 : index
      %72 = vector.load %arg8[%c0_51, %c0_52] : memref<1x32xf32, #tpu.memory_space<vmem>>, vector<1x32xf32>
      %73 = vector.broadcast %72 : vector<1x32xf32> to vector<16x32xf32>
      %74 = arith.addf %71, %73 : vector<16x32xf32>
      %c0_53 = arith.constant 0 : index
      %c0_54 = arith.constant 0 : index
      %75 = vector.load %arg9[%c0_53, %c0_54] : memref<1x1xf32, #tpu.memory_space<vmem>>, vector<1x1xf32>
      %76 = arith.negf %75 : vector<1x1xf32>
      %77 = math.exp %76 : vector<1x1xf32>
      %cst_55 = arith.constant 1.000000e+00 : f32
      %78 = vector.broadcast %cst_55 : f32 to vector<1x1xf32>
      %79 = arith.addf %78, %77 : vector<1x1xf32>
      %80 = arith.divf %78, %79 : vector<1x1xf32>
      %81 = vector.broadcast %80 : vector<1x1xf32> to vector<16x32xf32>
      %82 = arith.mulf %74, %81 : vector<16x32xf32>
      %c0_56 = arith.constant 0 : index
      %c0_57 = arith.constant 0 : index
      %83 = vector.load %arg6[%c0_56, %c0_57] : memref<16x32xf32, #tpu.memory_space<vmem>>, vector<16x32xf32>
      %cst_58 = arith.constant 1.000000e+00 : f32
      %84 = vector.broadcast %cst_58 : f32 to vector<1x1xf32>
      %85 = arith.subf %84, %80 : vector<1x1xf32>
      %86 = vector.broadcast %85 : vector<1x1xf32> to vector<16x32xf32>
      %87 = arith.mulf %83, %86 : vector<16x32xf32>
      %88 = arith.addf %82, %87 : vector<16x32xf32>
      %cst_59 = arith.constant dense<0.000000e+00> : vector<16xf32>
      %89 = vector.multi_reduction <add>, %88, %cst_59 [1] : vector<16x32xf32> to vector<16xf32>
      %90 = vector.shape_cast %89 : vector<16xf32> to vector<16x1xf32>
      %cst_60 = arith.constant 3.200000e+01 : f32
      %91 = vector.broadcast %cst_60 : f32 to vector<16x1xf32>
      %92 = arith.divf %90, %91 : vector<16x1xf32>
      %93 = vector.broadcast %92 : vector<16x1xf32> to vector<16x32xf32>
      %94 = arith.subf %88, %93 : vector<16x32xf32>
      %95 = arith.mulf %94, %94 : vector<16x32xf32>
      %cst_61 = arith.constant dense<0.000000e+00> : vector<16xf32>
      %96 = vector.multi_reduction <add>, %95, %cst_61 [1] : vector<16x32xf32> to vector<16xf32>
      %97 = vector.shape_cast %96 : vector<16xf32> to vector<16x1xf32>
      %cst_62 = arith.constant 3.200000e+01 : f32
      %98 = vector.broadcast %cst_62 : f32 to vector<16x1xf32>
      %99 = arith.divf %97, %98 : vector<16x1xf32>
      %100 = vector.broadcast %92 : vector<16x1xf32> to vector<16x32xf32>
      %101 = arith.subf %88, %100 : vector<16x32xf32>
      %cst_63 = arith.constant 9.99999974E-6 : f32
      %102 = vector.broadcast %cst_63 : f32 to vector<16x1xf32>
      %103 = arith.addf %99, %102 : vector<16x1xf32>
      %104 = math.rsqrt %103 : vector<16x1xf32>
      %105 = vector.broadcast %104 : vector<16x1xf32> to vector<16x32xf32>
      %106 = arith.mulf %101, %105 : vector<16x32xf32>
      %c0_64 = arith.constant 0 : index
      %c0_65 = arith.constant 0 : index
      %107 = vector.load %arg10[%c0_64, %c0_65] : memref<1x32xf32, #tpu.memory_space<vmem>>, vector<1x32xf32>
      %108 = vector.broadcast %107 : vector<1x32xf32> to vector<16x32xf32>
      %109 = arith.mulf %106, %108 : vector<16x32xf32>
      %c0_66 = arith.constant 0 : index
      %c0_67 = arith.constant 0 : index
      %110 = vector.load %arg11[%c0_66, %c0_67] : memref<1x32xf32, #tpu.memory_space<vmem>>, vector<1x32xf32>
      %111 = vector.broadcast %110 : vector<1x32xf32> to vector<16x32xf32>
      %112 = arith.addf %109, %111 : vector<16x32xf32>
      %c0_68 = arith.constant 0 : index
      %c0_69 = arith.constant 0 : index
      %113 = vector.load %arg12[%c0_68, %c0_69] : memref<16x32xf32, #tpu.memory_space<vmem>>, vector<16x32xf32>
      tpu.vector_store %arg12[%c0_68, %c0_69], %112 {strides = array<i32>} : memref<16x32xf32, #tpu.memory_space<vmem>>, vector<16x32xf32>,
    } else {
    }
    return
  }
  func.func @transform_0(%arg0: i32, %arg1: i32) -> (i32, i32, i32) {
    %c0_i32 = arith.constant 0 : i32
    %c0_i32_0 = arith.constant 0 : i32
    %c0_i32_1 = arith.constant 0 : i32
    return %c0_i32, %arg0, %c0_i32_0 : i32, i32, i32
  }
  func.func @transform_1(%arg0: i32, %arg1: i32) -> (i32, i32, i32) {
    %c0_i32 = arith.constant 0 : i32
    %c0_i32_0 = arith.constant 0 : i32
    %c0_i32_1 = arith.constant 0 : i32
    return %c0_i32, %arg1, %c0_i32_0 : i32, i32, i32
  }
  func.func @transform_2(%arg0: i32, %arg1: i32) -> (i32, i32, i32) {
    %c0_i32 = arith.constant 0 : i32
    %c0_i32_0 = arith.constant 0 : i32
    %c0_i32_1 = arith.constant 0 : i32
    return %c0_i32, %arg1, %c0_i32_0 : i32, i32, i32
  }
  func.func @transform_3(%arg0: i32, %arg1: i32) -> (i32, i32) {
    %c0_i32 = arith.constant 0 : i32
    return %arg0, %arg1 : i32, i32
  }
  func.func @transform_4(%arg0: i32, %arg1: i32) -> (i32, i32) {
    %c0_i32 = arith.constant 0 : i32
    %c0_i32_0 = arith.constant 0 : i32
    return %arg0, %c0_i32 : i32, i32
  }
  func.func @transform_5(%arg0: i32, %arg1: i32) -> (i32, i32) {
    %c0_i32 = arith.constant 0 : i32
    %c0_i32_0 = arith.constant 0 : i32
    %c0_i32_1 = arith.constant 0 : i32
    return %c0_i32, %c0_i32_0 : i32, i32
  }
  func.func @transform_6(%arg0: i32, %arg1: i32) -> (i32, i32) {
    %c0_i32 = arith.constant 0 : i32
    %c0_i32_0 = arith.constant 0 : i32
    %c0_i32_1 = arith.constant 0 : i32
    return %c0_i32, %c0_i32_0 : i32, i32
  }
  func.func @transform_7(%arg0: i32, %arg1: i32) -> (i32, i32) {
    %c0_i32 = arith.constant 0 : i32
    %c0_i32_0 = arith.constant 0 : i32
    %c0_i32_1 = arith.constant 0 : i32
    return %c0_i32, %c0_i32_0 : i32, i32
  }
  func.func @transform_8(%arg0: i32, %arg1: i32) -> (i32, i32) {
    %c0_i32 = arith.constant 0 : i32
    %c0_i32_0 = arith.constant 0 : i32
    %c0_i32_1 = arith.constant 0 : i32
    return %c0_i32, %c0_i32_0 : i32, i32
  }
  func.func @transform_9(%arg0: i32, %arg1: i32) -> (i32, i32) {
    %c0_i32 = arith.constant 0 : i32
    %c0_i32_0 = arith.constant 0 : i32
    %c0_i32_1 = arith.constant 0 : i32
    return %c0_i32, %c0_i32_0 : i32, i32
  }
  func.func @transform_10(%arg0: i32, %arg1: i32) -> (i32, i32) {
    %c0_i32 = arith.constant 0 : i32
    %c0_i32_0 = arith.constant 0 : i32
    return %arg0, %c0_i32 : i32, i32
  }
}

</mosaic_0001>

<bundles_post_ra>
// kernel: mul.1
= control target key start
LH: loop header
LB: loop body
LE: loop exit
PB: predicated region body
PF: predicated region fallthrough
CT: control target
= control target key end

     0   :  { %s34_s0 = inlined_call_operand.vmem [shape: f32[1,32], index: 0, kind: input, shape index: {}]   ;;  %s35_s1 = inlined_call_operand.vmem [shape: f32[1,32], index: 1, kind: input, shape index: {}]   ;;  %s36_s2 = inlined_call_operand.vmem [shape: f32[1,32], index: 2, kind: output, shape index: {}]  }
   0x1   :  { %v3_v0 = vld [vmem:[%s34_s0] sm:$0x1] }
   0x2   :  { %v4_v1 = vld [vmem:[%s35_s1] sm:$0x1] }
   0x3   :  { %v7_v2 = vmul.f32 %v4_v1, %v3_v0 }
   0x5   :  { %9 = vst [vmem:[%s36_s2] sm:$0x1] %v7_v2 }

// kernel: hgt_forward.6
= control target key start
LH: loop header
LB: loop body
LE: loop exit
PB: predicated region body
PF: predicated region fallthrough
CT: control target
= control target key end

     0   :  { %vm21_vm0 = vcmask 64512   ;;  %vm69_vm1 = vcmask 261120   ;;  %s122_s1 = inlined_call_operand.vmem [shape: f32[8,32], index: 1, kind: input, shape index: {}]   ;;  %s123_s0 = inlined_call_operand.vmem [shape: f32[16,8], index: 0, kind: input, shape index: {}]   ;;  %s124_s2 = inlined_call_operand.vmem [shape: f32[1,32], index: 2, kind: input, shape index: {}]   ;;  %s125_s3 = inlined_call_operand.vmem [shape: f32[16,32], index: 3, kind: output, shape index: {}]  }
   0x1   :  { %v16_v0 = vld [vmem:[%s122_s1] sm:$0xff]  ;;  %v15_v2 = vld [vmem:[%s123_s0 + $0x8] sm:$0xff] }
   0x2   :  { %v14_v1 = vld [vmem:[%s123_s0] sm:$0xff]  ;;  %43 = vmatpush.msra.mxu0 %v16_v0  ;;  %78 = vmatpush.msra.mxu1 %v16_v0 }
   0x3   :  { %76 = vmatmul.msk.f32.vlgmr.msra.gmra.mxu0 %vm21_vm0, %v14_v1  ;;  %77 = vmatmul.msk.f32.vlgmr.msra.gmra.mxu1 %vm21_vm0, %v15_v2  ;;  %v79_v3 = vld [vmem:[%s124_s2] ss:$0 sm:$0xff] }
  0x80   :  { %v45_v4 = vpop.f32.mrf.mxu0  ;;  %v48_v5 = vpop.f32.mrf.mxu1 }
  0x81   :  { %v46_v6 = vadd.f32 %v79_v3, %v45_v4  ;;  %v49_v7 = vadd.f32 %v79_v3, %v48_v5 }
  0x83   :  { %v51_v8 = vmul.f32 %v46_v6, %v46_v6  ;;  %v52_v9 = vmul.f32 %v49_v7, %v49_v7 }
  0x85   :  { %v53_v10 = vmul.f32 %v51_v8, %v46_v6  ;;  %v54_v11 = vmul.f32 %v52_v9, %v49_v7 }
  0x87   :  { %v55_v12 = vmul.f32 0.044715, %v53_v10  ;;  %v56_v13 = vmul.f32 0.044715, %v54_v11 }
  0x89   :  { %v57_v14 = vadd.f32 %v55_v12, %v46_v6  ;;  %v58_v15 = vadd.f32 %v56_v13, %v49_v7 }
  0x8b   :  { %v59_v16 = vmul.f32 0.7978846, %v57_v14  ;;  %v60_v17 = vmul.f32 0.7978846, %v58_v15 }
  0x8d   :  { %80 = vtanh.f32 %v59_v16 }
  0x8e   :  { %82 = vtanh.f32 %v60_v17 }
  0x93   :  { %v81_v18 = vpop.eup %80 }
  0x94   :  { %v83_v19 = vpop.eup %82  ;;  %v63_v20 = vadd.f32 1.0, %v81_v18 }
  0x95   :  { %v64_v21 = vadd.f32 1.0, %v83_v19 }
  0x96   :  { %v65_v22 = vmul.f32 0.5, %v63_v20 }
  0x97   :  { %v66_v23 = vmul.f32 0.5, %v64_v21 }
  0x98   :  { %v67_v24 = vmul.f32 %v65_v22, %v46_v6 }
  0x99   :  { %v68_v25 = vmul.f32 %v66_v23, %v49_v7 }
  0x9a   :  { %70 = vst.msk [vmem:[%s125_s3] sm:$0xff] %vm69_vm1, %v67_v24 }
  0x9b   :  { %71 = vst.msk [vmem:[%s125_s3 + $0x8] sm:$0xff] %vm69_vm1, %v68_v25 }

// kernel: hgt_forward.7
= control target key start
LH: loop header
LB: loop body
LE: loop exit
PB: predicated region body
PF: predicated region fallthrough
CT: control target
= control target key end

     0   :  { %vm24_vm0 = vcmask 261120   ;;  %vm54_vm1 = vcmask 785408   ;;  %s115_s1 = inlined_call_operand.vmem [shape: f32[32,96], index: 1, kind: input, shape index: {}]   ;;  %s116_s2 = inlined_call_operand.vmem [shape: f32[1,96], index: 2, kind: input, shape index: {}]   ;;  %s117_s0 = inlined_call_operand.vmem [shape: f32[16,32], index: 0, kind: input, shape index: {}]   ;;  %s118_s3 = inlined_call_operand.vmem [shape: f32[16,96], index: 3, kind: output, shape index: {}]  }
   0x1   :  { %v19_v0 = vld [vmem:[%s115_s1 + $0x18] sm:$0xff]  ;;  %v18_v1 = vld [vmem:[%s115_s1 + $0x10] sm:$0xff]  ;;  %v17_v2 = vld [vmem:[%s115_s1 + $0x8] sm:$0xff] }
   0x2   :  { %43 = vmatpush.msra.mxu0 %v19_v0  ;;  %63 = vmatpush.msra.mxu1 %v19_v0  ;;  %v16_v3 = vld [vmem:[%s115_s1] sm:$0xff]  ;;  %v15_v5 = vld [vmem:[%s117_s0 + $0x8] sm:$0xff] }
   0x3   :  { %v14_v4 = vld [vmem:[%s117_s0] sm:$0xff] }
   0x4   :  { %44 = vmatpush.msra.mxu0 %v18_v1  ;;  %64 = vmatpush.msra.mxu1 %v18_v1  ;;  %v67_v6 = vld [vmem:[%s116_s2] ss:$0 sm:$0xff] }
   0x6   :  { %45 = vmatpush.msra.mxu0 %v17_v2  ;;  %65 = vmatpush.msra.mxu1 %v17_v2 }
   0x8   :  { %46 = vmatpush.msra.mxu0 %v16_v3  ;;  %66 = vmatpush.msra.mxu1 %v16_v3 }
   0x9   :  { %61 = vmatmul.msk.f32.vlgmr.msra.gmra.mxu0 %vm24_vm0, %v14_v4  ;;  %62 = vmatmul.msk.f32.vlgmr.msra.gmra.mxu1 %vm24_vm0, %v15_v5 }
  0x86   :  { %v48_v7 = vpop.f32.mrf.mxu0  ;;  %v51_v8 = vpop.f32.mrf.mxu1 }
  0x87   :  { %v49_v9 = vadd.f32 %v67_v6, %v48_v7  ;;  %v52_v10 = vadd.f32 %v67_v6, %v51_v8 }
  0x89   :  { %55 = vst.msk [vmem:[%s118_s3] sm:$0xff] %vm54_vm1, %v49_v9 }
  0x8a   :  { %56 = vst.msk [vmem:[%s118_s3 + $0x8] sm:$0xff] %vm54_vm1, %v52_v10 }

// kernel: hgt_forward.11
= control target key start
LH: loop header
LB: loop body
LE: loop exit
PB: predicated region body
PF: predicated region fallthrough
CT: control target
= control target key end

     0   :  { %vm24_vm0 = vcmask 261120   ;;  %vm54_vm1 = vcmask 31744   ;;  %s115_s1 = inlined_call_operand.vmem [shape: f32[32,4], index: 1, kind: input, shape index: {}]   ;;  %s116_s2 = inlined_call_operand.vmem [shape: f32[1,4], index: 2, kind: input, shape index: {}]   ;;  %s117_s0 = inlined_call_operand.vmem [shape: f32[16,32], index: 0, kind: input, shape index: {}]   ;;  %s118_s3 = inlined_call_operand.vmem [shape: f32[16,4], index: 3, kind: output, shape index: {}]  }
   0x1   :  { %v19_v0 = vld [vmem:[%s115_s1 + $0x18] sm:$0xff]  ;;  %v18_v1 = vld [vmem:[%s115_s1 + $0x10] sm:$0xff]  ;;  %v17_v2 = vld [vmem:[%s115_s1 + $0x8] sm:$0xff] }
   0x2   :  { %43 = vmatpush.msra.mxu0 %v19_v0  ;;  %63 = vmatpush.msra.mxu1 %v19_v0  ;;  %v16_v3 = vld [vmem:[%s115_s1] sm:$0xff]  ;;  %v15_v5 = vld [vmem:[%s117_s0 + $0x8] sm:$0xff] }
   0x3   :  { %v14_v4 = vld [vmem:[%s117_s0] sm:$0xff] }
   0x4   :  { %44 = vmatpush.msra.mxu0 %v18_v1  ;;  %64 = vmatpush.msra.mxu1 %v18_v1  ;;  %v67_v6 = vld [vmem:[%s116_s2] ss:$0 sm:$0xff] }
   0x6   :  { %45 = vmatpush.msra.mxu0 %v17_v2  ;;  %65 = vmatpush.msra.mxu1 %v17_v2 }
   0x8   :  { %46 = vmatpush.msra.mxu0 %v16_v3  ;;  %66 = vmatpush.msra.mxu1 %v16_v3 }
   0x9   :  { %61 = vmatmul.msk.f32.vlgmr.msra.gmra.mxu0 %vm24_vm0, %v14_v4  ;;  %62 = vmatmul.msk.f32.vlgmr.msra.gmra.mxu1 %vm24_vm0, %v15_v5 }
  0x86   :  { %v48_v7 = vpop.f32.mrf.mxu0  ;;  %v51_v8 = vpop.f32.mrf.mxu1 }
  0x87   :  { %v49_v9 = vadd.f32 %v67_v6, %v48_v7  ;;  %v52_v10 = vadd.f32 %v67_v6, %v51_v8 }
  0x89   :  { %55 = vst.msk [vmem:[%s118_s3] sm:$0xff] %vm54_vm1, %v49_v9 }
  0x8a   :  { %56 = vst.msk [vmem:[%s118_s3 + $0x8] sm:$0xff] %vm54_vm1, %v52_v10 }

// kernel: hgt_forward.8
= control target key start
LH: loop header
LB: loop body
LE: loop exit
PB: predicated region body
PF: predicated region fallthrough
CT: control target
= control target key end

     0   :  { %vm58_vm0 = vcmask 64512   ;;  %vm41_vm1 = vcmask 7168   ;;  %v1077_v18 = vmov -1e+30   ;;  %vm258_vm3 = vcmask 130048   ;;  %s1517_s1 = inlined_call_operand.vmem [shape: f32[4,16,8], index: 1, kind: input, shape index: {}]   ;;  %s1518_s0 = inlined_call_operand.vmem [shape: f32[4,16,8], index: 0, kind: input, shape index: {}]   ;;  %s1519_s3 = inlined_call_operand.vmem [shape: bf16[16,16], index: 3, kind: input, shape index: {}]   ;;  %s1520_s2 = inlined_call_operand.vmem [shape: f32[4,16,8], index: 2, kind: input, shape index: {}]   ;;  %s1521_s7 = inlined_call_operand.<no memory space> [shape: f32[1,1], index: 7, kind: input, shape index: {}]   ;;  %s1522_s5 = inlined_call_operand.vmem [shape: f32[32,32], index: 5, kind: input, shape index: {}]   ;;  %s1523_s6 = inlined_call_operand.vmem [shape: f32[1,32], index: 6, kind: input, shape index: {}]   ;;  %s1524_s4 = inlined_call_operand.vmem [shape: f32[16,32], index: 4, kind: input, shape index: {}]   ;;  %s1525_s8 = inlined_call_operand.vmem [shape: f32[1,32], index: 8, kind: input, shape index: {}]   ;;  %s1526_s9 = inlined_call_operand.vmem [shape: f32[1,32], index: 9, kind: input, shape index: {}]   ;;  %s1527_s10 = inlined_call_operand.vmem [shape: f32[16,32], index: 10, kind: output, shape index: {}]  }
   0x1   :  { %v76_v0 = vld [vmem:[%s1517_s1 + $0x8] sm:$0xff]  ;;  %v78_v1 = vld [vmem:[%s1517_s1 + $0x18] sm:$0xff]  ;;  %v75_v3 = vld [vmem:[%s1517_s1] sm:$0xff]  ;;  %44 = vst.msk [vmem:[#allocation2 + $0x10] sm:$0xff] %vm41_vm1, %v1077_v18  ;;  %v1078_v46 = vmov 0.0   ;;  %v1079_v47 = vmov 0  }
   0x2   :  { %v80_v2 = vld [vmem:[%s1517_s1 + $0x28] sm:$0xff]  ;;  %972 = vmatpush.xpose.msk.msra.mxu0 %vm58_vm0, %v76_v0  ;;  %976 = vmatpush.xpose.msk.msra.mxu1 %vm58_vm0, %v78_v1  ;;  %v77_v4 = vld [vmem:[%s1517_s1 + $0x10] sm:$0xff]  ;;  %v79_v5 = vld [vmem:[%s1517_s1 + $0x20] sm:$0xff]  ;;  %42 = vst.msk [vmem:[#allocation2] sm:$0xff] %vm41_vm1, %v1077_v18 }
   0x3   :  { %980 = vmatpush.xpose.msk.msra.mxu2 %vm58_vm0, %v80_v2  ;;  %v82_v6 = vld [vmem:[%s1517_s1 + $0x38] sm:$0xff]  ;;  %v67_v7 = vld [vmem:[%s1518_s0] sm:$0xff]  ;;  %v69_v8 = vld [vmem:[%s1518_s0 + $0x10] sm:$0xff]  ;;  %43 = vst.msk [vmem:[#allocation2 + $0x8] sm:$0xff] %vm41_vm1, %v1077_v18  ;;  %1013 = vset.pattern.permute.xlu2 %v1079_v47 }
   0x4   :  { %984 = vmatpush.xpose.msk.msra.mxu3 %vm58_vm0, %v82_v6  ;;  %v71_v9 = vld [vmem:[%s1518_s0 + $0x20] sm:$0xff]  ;;  %v81_v10 = vld [vmem:[%s1517_s1 + $0x30] sm:$0xff]  ;;  %v70_v12 = vld [vmem:[%s1518_s0 + $0x18] sm:$0xff]  ;;  %45 = vst.msk [vmem:[#allocation2 + $0x18] sm:$0xff] %vm41_vm1, %v1077_v18  ;;  %1014 = vset.pattern.permute.xlu0 %v1079_v47 }
   0x5   :  { %v73_v11 = vld [vmem:[%s1518_s0 + $0x30] sm:$0xff]  ;;  %v68_v13 = vld [vmem:[%s1518_s0 + $0x8] sm:$0xff]  ;;  %v74_v15 = vld [vmem:[%s1518_s0 + $0x38] sm:$0xff]  ;;  %46 = vst.msk [vmem:[#allocation2 + $0x20] sm:$0xff] %vm41_vm1, %v1077_v18  ;;  %1015 = vset.pattern.permute.xlu1 %v1079_v47 }
   0x6   :  { %973 = vmatpush.xpose.msk.msra.mxu0 %vm58_vm0, %v75_v3  ;;  %977 = vmatpush.xpose.msk.msra.mxu1 %vm58_vm0, %v77_v4  ;;  %v72_v14 = vld [vmem:[%s1518_s0 + $0x28] sm:$0xff]  ;;  %v1006_v16 = vld [vmem:[%s1519_s3] sm:$0xff]   ;;  %47 = vst.msk [vmem:[#allocation2 + $0x28] sm:$0xff] %vm41_vm1, %v1077_v18 }
   0x7   :  { %981 = vmatpush.xpose.msk.msra.mxu2 %vm58_vm0, %v79_v5  ;;  %v1007_v17 = vunpack.c.l.bf16 %v1006_v16  ;;  %48 = vst.msk [vmem:[#allocation2 + $0x30] sm:$0xff] %vm41_vm1, %v1077_v18  ;;  %v1008_v26 = vunpack.c.h.bf16 %v1006_v16 }
   0x8   :  { %985 = vmatpush.xpose.msk.msra.mxu3 %vm58_vm0, %v81_v10  ;;  %49 = vst.msk [vmem:[#allocation2 + $0x38] sm:$0xff] %vm41_vm1, %v1077_v18  ;;  %v252_v48 = vld [vmem:[#allocation2 + $0x10] sm:$0xff] }
   0x9   :  { %974 = vmatmul.msk.f32.vlgmr.msra.gmra.mxu0 %vm58_vm0, %v67_v7  ;;  %978 = vmatmul.msk.f32.vlgmr.msra.gmra.mxu1 %vm58_vm0, %v69_v8  ;;  %vm1206_vm2 = vcmp.gt.f32.partialorder %v1007_v17, 0.0  ;;  %vm1227_vm4 = vcmp.gt.f32.partialorder %v1008_v26, 0.0  ;;  %65 = vst.msk [vmem:[#allocation4 + $0x30] sm:$0xff] %vm58_vm0, %v1078_v46  ;;  %v250_v49 = vld [vmem:[#allocation2] sm:$0xff] }
   0xa   :  { %982 = vmatmul.msk.f32.vlgmr.msra.gmra.mxu2 %vm58_vm0, %v71_v9  ;;  %50 = vst.msk [vmem:[#allocation3] sm:$0xff] %vm41_vm1, %v1078_v46  ;;  %v1315_v10 = vld [vmem:[#allocation2 + $0x8] sm:$0xff] }
   0xb   :  { %986 = vmatmul.msk.f32.vlgmr.msra.gmra.mxu3 %vm58_vm0, %v73_v11  ;;  %51 = vst.msk [vmem:[#allocation3 + $0x8] sm:$0xff] %vm41_vm1, %v1078_v46  ;;  %v1285_v55 = vld [vmem:[#allocation2 + $0x18] sm:$0xff] }
   0xc   :  { %52 = vst.msk [vmem:[#allocation3 + $0x10] sm:$0xff] %vm41_vm1, %v1078_v46  ;;  %v254_v54 = vld [vmem:[#allocation2 + $0x20] sm:$0xff] }
   0xd   :  { %53 = vst.msk [vmem:[#allocation3 + $0x18] sm:$0xff] %vm41_vm1, %v1078_v46  ;;  %v1295_v63 = vld [vmem:[#allocation2 + $0x28] sm:$0xff] }
   0xe   :  { %54 = vst.msk [vmem:[#allocation3 + $0x20] sm:$0xff] %vm41_vm1, %v1078_v46  ;;  %v256_v62 = vld [vmem:[#allocation2 + $0x30] sm:$0xff] }
   0xf   :  { %55 = vst.msk [vmem:[#allocation3 + $0x28] sm:$0xff] %vm41_vm1, %v1078_v46  ;;  %v1297_v4 = vld [vmem:[#allocation2 + $0x38] sm:$0xff] }
  0x10   :  { %56 = vst.msk [vmem:[#allocation3 + $0x30] sm:$0xff] %vm41_vm1, %v1078_v46 }
  0x11   :  { %979 = vmatmul.msk.f32.gmra.mxu1 %vm58_vm0, %v70_v12  ;;  %975 = vmatmul.msk.f32.gmra.mxu0 %vm58_vm0, %v68_v13  ;;  %57 = vst.msk [vmem:[#allocation3 + $0x38] sm:$0xff] %vm41_vm1, %v1078_v46 }
  0x12   :  { %983 = vmatmul.msk.f32.gmra.mxu2 %vm58_vm0, %v72_v14  ;;  %59 = vst.msk [vmem:[#allocation4] sm:$0xff] %vm58_vm0, %v1078_v46 }
  0x13   :  { %987 = vmatmul.msk.f32.gmra.mxu3 %vm58_vm0, %v74_v15  ;;  %60 = vst.msk [vmem:[#allocation4 + $0x8] sm:$0xff] %vm58_vm0, %v1078_v46 }
  0x14   :  { %61 = vst.msk [vmem:[#allocation4 + $0x10] sm:$0xff] %vm58_vm0, %v1078_v46 }
  0x15   :  { %62 = vst.msk [vmem:[#allocation4 + $0x18] sm:$0xff] %vm58_vm0, %v1078_v46 }
  0x16   :  { %63 = vst.msk [vmem:[#allocation4 + $0x20] sm:$0xff] %vm58_vm0, %v1078_v46 }
  0x17   :  { %64 = vst.msk [vmem:[#allocation4 + $0x28] sm:$0xff] %vm58_vm0, %v1078_v46 }
  0x18   :  { %66 = vst.msk [vmem:[#allocation4 + $0x38] sm:$0xff] %vm58_vm0, %v1078_v46 }
  0x86   :  { %v131_v20 = vpop.f32.mrf.mxu0  ;;  %v166_v21 = vpop.f32.mrf.mxu1 }
  0x87   :  { %v1215_v22 = vsel %vm1206_vm2, %v131_v20, -1e+30  ;;  %v1219_v23 = vsel %vm1206_vm2, %v166_v21, -1e+30 }
  0x88   :  { %v265_v24 = vsel %vm258_vm3, %v1219_v23, -inf  ;;  %v259_v25 = vsel %vm258_vm3, %v1215_v22, -inf }
  0x89   :  { %266 = vmax.xlane.f32.xlu2 %v265_v24  ;;  %260 = vmax.xlane.f32.xlu1 %v259_v25 }
  0x8d   :  { %v201_v28 = vpop.f32.mrf.mxu2 }
  0x8e   :  { %v1233_v29 = vsel %vm1206_vm2, %v201_v28, -1e+30  ;;  %v169_v30 = vpop.f32.mrf.mxu1  ;;  %v236_v34 = vpop.f32.mrf.mxu3  ;;  %v88_v28 = vld [vmem:[%s1520_s2 + $0x28] sm:$0xff] }
  0x8f   :  { %v1237_v31 = vsel %vm1227_vm4, %v169_v30, -1e+30  ;;  %v271_v32 = vsel %vm258_vm3, %v1233_v29, -inf  ;;  %v1245_v35 = vsel %vm1206_vm2, %v236_v34, -1e+30  ;;  %v134_v40 = vpop.f32.mrf.mxu0  ;;  %578 = vmatpush.msrb.mxu2 %v88_v28  ;;  %v87_v30 = vld [vmem:[%s1520_s2 + $0x20] sm:$0xff] }
  0x90   :  { %272 = vmax.xlane.f32.xlu0 %v271_v32  ;;  %v268_v33 = vsel %vm258_vm3, %v1237_v31, -inf  ;;  %v277_v37 = vsel %vm258_vm3, %v1245_v35, -inf  ;;  %v1263_v44 = vsel %vm1227_vm4, %v134_v40, -1e+30  ;;  %v84_v32 = vld [vmem:[%s1520_s2 + $0x8] sm:$0xff]  ;;  %v86_v34 = vld [vmem:[%s1520_s2 + $0x18] sm:$0xff] }
  0x91   :  { %269 = vmax.xlane.f32.xlu1 %v268_v33  ;;  %v262_v45 = vsel %vm258_vm3, %v1263_v44, -inf  ;;  %579 = vmatpush.msrb.mxu2 %v87_v30  ;;  %v83_v33 = vld [vmem:[%s1520_s2] sm:$0xff] }
  0x92   :  { %520 = vmatpush.msrb.mxu0 %v84_v32  ;;  %549 = vmatpush.msrb.mxu1 %v86_v34 }
  0x94   :  { %521 = vmatpush.msrb.mxu0 %v83_v33 }
  0x95   :  { %v204_v36 = vpop.f32.mrf.mxu2 }
  0x96   :  { %v1251_v38 = vsel %vm1227_vm4, %v204_v36, -1e+30  ;;  %v239_v41 = vpop.f32.mrf.mxu3  ;;  %v85_v36 = vld [vmem:[%s1520_s2 + $0x10] sm:$0xff] }
  0x97   :  { %v274_v39 = vsel %vm258_vm3, %v1251_v38, -inf  ;;  %v1257_v42 = vsel %vm1227_vm4, %v239_v41, -1e+30  ;;  %550 = vmatpush.msrb.mxu1 %v85_v36 }
  0x98   :  { %278 = vmax.xlane.f32.xlu0 %v277_v37  ;;  %v280_v43 = vsel %vm258_vm3, %v1257_v42, -inf }
  0x99   :  { %275 = vmax.xlane.f32.xlu1 %v274_v39  ;;  %281 = vmax.xlane.f32.xlu2 %v280_v43 }
  0xa0   :  { %263 = vmax.xlane.f32.xlu0 %v262_v45  ;;  %v90_v45 = vld [vmem:[%s1520_s2 + $0x38] sm:$0xff] }
  0xa1   :  { %607 = vmatpush.msrb.mxu3 %v90_v45 }
  0xfc   :  { %v267_v50 = vpop.xlane.xlu2 %266  ;;  %v261_v51 = vpop.xlane.xlu1 %260 }
  0xfd   :  { %v285_v52 = vmax.f32 %v252_v48, %v267_v50  ;;  %v283_v53 = vmax.f32 %v250_v49, %v261_v51 }
  0xff   :  { %634 = vst.msk [vmem:[#allocation2 + $0x10] sm:$0xff] %vm41_vm1, %v285_v52  ;;  %v291_v60 = vsub.f32 %v250_v49, %v283_v53  ;;  %v293_v16 = vsub.f32 %v252_v48, %v285_v52  ;;  %v89_v48 = vld [vmem:[%s1520_s2 + $0x30] sm:$0xff] }
 0x100   :  { %632 = vst.msk [vmem:[#allocation2] sm:$0xff] %vm41_vm1, %v283_v53  ;;  %608 = vmatpush.msrb.mxu3 %v89_v48 }
 0x101   :  { %v299_v0 = vmul.f32 1.442695, %v291_v60  ;;  %v303_v18 = vmul.f32 1.442695, %v293_v16 }
 0x103   :  { %v273_v56 = vpop.xlane.xlu0 %272  ;;  %1019 = vpow2.f32 %v299_v0 }
 0x104   :  { %v287_v57 = vmax.f32 %v254_v54, %v273_v56  ;;  %v270_v58 = vpop.xlane.xlu1 %269 }
 0x105   :  { %v1288_v59 = vmax.f32 %v1285_v55, %v270_v58 }
 0x106   :  { %636 = vst.msk [vmem:[#allocation2 + $0x20] sm:$0xff] %vm41_vm1, %v287_v57  ;;  %337 = vperm.xlu2 %1013, %v287_v57   ;;  %v295_v20 = vsub.f32 %v254_v54, %v287_v57 }
 0x107   :  { %v294_v61 = vsub.f32 %v1285_v55, %v1288_v59  ;;  %635 = vst.msk [vmem:[#allocation2 + $0x18] sm:$0xff] %vm41_vm1, %v1288_v59 }
 0x108   :  { %v307_v21 = vmul.f32 1.442695, %v295_v20 }
 0x109   :  { %v1320_v13 = vpop.eup %1019 }
 0x10b   :  { %v279_v1 = vpop.xlane.xlu0 %278 }
 0x10c   :  { %v289_v2 = vmax.f32 %v256_v62, %v279_v1  ;;  %v276_v3 = vpop.xlane.xlu1 %275  ;;  %v282_v6 = vpop.xlane.xlu2 %281 }
 0x10d   :  { %v1300_v5 = vmax.f32 %v1295_v63, %v276_v3  ;;  %v1309_v8 = vmax.f32 %v1297_v4, %v282_v6 }
 0x10e   :  { %638 = vst.msk [vmem:[#allocation2 + $0x30] sm:$0xff] %vm41_vm1, %v289_v2  ;;  %317 = vperm.xlu2 %1013, %v283_v53   ;;  %347 = vperm.xlu0 %1014, %v289_v2   ;;  %v297_v15 = vsub.f32 %v256_v62, %v289_v2 }
 0x10f   :  { %v296_v7 = vsub.f32 %v1295_v63, %v1300_v5  ;;  %637 = vst.msk [vmem:[#allocation2 + $0x28] sm:$0xff] %vm41_vm1, %v1300_v5  ;;  %342 = vperm.xlu1 %1015, %v1300_v5   ;;  %v298_v9 = vsub.f32 %v1297_v4, %v1309_v8  ;;  %v15_v63 = vstv %s1521_s7  ;;  %v391_v5 = vld [vmem:[#allocation3 + $0x20] sm:$0xff] }
 0x110   :  { %639 = vst.msk [vmem:[#allocation2 + $0x38] sm:$0xff] %vm41_vm1, %v1309_v8  ;;  %v311_v17 = vmul.f32 1.442695, %v297_v15 }
 0x111   :  { %v309_v4 = vmul.f32 1.442695, %v296_v7  ;;  %16 = vst [vmem:[#allocation5] sm:$0x1] %v15_v63 }
 0x112   :  { %1021 = vpow2.f32 %v311_v17 }
 0x113   :  { %v264_v11 = vpop.xlane.xlu0 %263  ;;  %1023 = vpow2.f32 %v303_v18 }
 0x114   :  { %v1318_v12 = vmax.f32 %v1315_v10, %v264_v11  ;;  %1025 = vpow2.f32 %v307_v21 }
 0x116   :  { %327 = vperm.xlu2 %1013, %v285_v52   ;;  %454 = vperm.xlu0 %1014, %v1320_v13   ;;  %v292_v14 = vsub.f32 %v1315_v10, %v1318_v12  ;;  %633 = vst.msk [vmem:[#allocation2 + $0x8] sm:$0xff] %vm41_vm1, %v1318_v12 }
 0x117   :  { %352 = vperm.xlu1 %1015, %v1309_v8   ;;  %v305_v8 = vmul.f32 1.442695, %v294_v61 }
 0x118   :  { %v1330_v24 = vpop.eup %1021 }
 0x119   :  { %v1332_v25 = vpop.eup %1023 }
 0x11a   :  { %v1336_v26 = vpop.eup %1025 }
 0x11b   :  { %v399_v55 = vmul.f32 %v1336_v26, %v391_v5 }
 0x11e   :  { %322 = vperm.xlu2 %1013, %v1318_v12  }
 0x11f   :  { %332 = vperm.xlu1 %1015, %v1288_v59  }
 0x126   :  { %484 = vperm.xlu2 %1013, %v1330_v24  }
 0x127   :  { %464 = vperm.xlu1 %1015, %v1332_v25  }
 0x12f   :  { %474 = vperm.xlu1 %1015, %v1336_v26   ;;  %v389_v26 = vld [vmem:[#allocation3 + $0x10] sm:$0xff] }
 0x160   :  { %v338_v37 = vpop.permute.xlu2 %337 }
 0x161   :  { %v359_v39 = vsub.f32 %v1233_v29, %v338_v37 }
 0x163   :  { %v371_v40 = vmul.f32 1.442695, %v359_v39 }
 0x165   :  { %1027 = vpow2.f32 %v371_v40  ;;  %v313_v40 = vmul.f32 1.442695, %v298_v9 }
 0x168   :  { %v318_v41 = vpop.permute.xlu2 %317 }
 0x169   :  { %v355_v43 = vsub.f32 %v1215_v22, %v318_v41  ;;  %v301_v41 = vmul.f32 1.442695, %v292_v14 }
 0x16b   :  { %v1028_v46 = vpop.eup %1027  ;;  %v363_v47 = vmul.f32 1.442695, %v355_v43 }
 0x16c   :  { %v383_v49 = vsel %vm1206_vm2, %v1028_v46, 0.0  ;;  %v387_v46 = vld [vmem:[#allocation3] sm:$0xff] }
 0x16d   :  { %1029 = vpow2.f32 %v363_v47  ;;  %992 = vmatmul.msk.f32.vlgmr.msrb.gmra.mxu2 %vm258_vm3, %v383_v49  ;;  %v415_v22 = vsel %vm258_vm3, %v383_v49, 0.0  ;;  %v395_v47 = vmul.f32 %v1320_v13, %v387_v46 }
 0x16e   :  { %416 = vadd.xlane.f32.xlu0 %v415_v22  ;;  %v861_v22 = vld [vmem:[#allocation5] sm:$0x1] }
 0x170   :  { %v328_v29 = vpop.permute.xlu2 %327 }
 0x171   :  { %v357_v50 = vsub.f32 %v1219_v23, %v328_v29 }
 0x173   :  { %v1030_v51 = vpop.eup %1029  ;;  %v367_v52 = vmul.f32 1.442695, %v357_v50 }
 0x174   :  { %v379_v53 = vsel %vm1206_vm2, %v1030_v51, 0.0  ;;  %v448_v51 = vld [vmem:[#allocation4 + $0x20] sm:$0xff] }
 0x175   :  { %1031 = vpow2.f32 %v367_v52  ;;  %988 = vmatmul.msk.f32.vlgmr.msrb.gmra.mxu0 %vm258_vm3, %v379_v53  ;;  %v403_v54 = vsel %vm258_vm3, %v379_v53, 0.0  ;;  %v1004_v52 = vmul.f32 -1.442695, %v861_v22 }
 0x176   :  { %404 = vadd.xlane.f32.xlu1 %v403_v54  ;;  %v444_v54 = vld [vmem:[#allocation4] sm:$0xff] }
 0x178   :  { %v323_v56 = vpop.permute.xlu2 %322 }
 0x179   :  { %v356_v57 = vsub.f32 %v1263_v44, %v323_v56 }
 0x17b   :  { %v1032_v58 = vpop.eup %1031  ;;  %v365_v60 = vmul.f32 1.442695, %v356_v57 }
 0x17c   :  { %v381_v62 = vsel %vm1206_vm2, %v1032_v58, 0.0  ;;  %v397_v58 = vmul.f32 %v1332_v25, %v389_v26  ;;  %v446_v25 = vld [vmem:[#allocation4 + $0x10] sm:$0xff] }
 0x17d   :  { %1033 = vpow2.f32 %v365_v60  ;;  %990 = vmatmul.msk.f32.vlgmr.msrb.gmra.mxu1 %vm258_vm3, %v381_v62  ;;  %v409_v23 = vsel %vm258_vm3, %v381_v62, 0.0 }
 0x17e   :  { %410 = vadd.xlane.f32.xlu2 %v409_v23 }
 0x180   :  { %v348_v0 = vpop.permute.xlu0 %347  ;;  %v1433_v48 = vpop.permute.xlu2 %484 }
 0x181   :  { %v361_v1 = vsub.f32 %v1245_v35, %v348_v0  ;;  %v343_v2 = vpop.permute.xlu1 %342 }
 0x182   :  { %v360_v3 = vsub.f32 %v1251_v38, %v343_v2 }
 0x183   :  { %v1034_v6 = vpop.eup %1033  ;;  %v375_v11 = vmul.f32 1.442695, %v361_v1 }
 0x184   :  { %v373_v44 = vmul.f32 1.442695, %v360_v3  ;;  %v380_v15 = vsel %vm1227_vm4, %v1034_v6, 0.0 }
 0x185   :  { %1035 = vpow2.f32 %v375_v11  ;;  %989 = vmatmul.msk.f32.gmra.mxu0 %vm258_vm3, %v380_v15  ;;  %v406_v34 = vsel %vm258_vm3, %v380_v15, 0.0 }
 0x186   :  { %1037 = vpow2.f32 %v373_v44 }
 0x188   :  { %v455_v14 = vpop.permute.xlu0 %454 }
 0x189   :  { %v353_v16 = vpop.permute.xlu1 %352  ;;  %v492_v13 = vmul.f32 %v455_v14, %v444_v54 }
 0x18a   :  { %v362_v17 = vsub.f32 %v1257_v42, %v353_v16 }
 0x18b   :  { %v1036_v18 = vpop.eup %1035 }
 0x18c   :  { %v1038_v20 = vpop.eup %1037  ;;  %v377_v21 = vmul.f32 1.442695, %v362_v17  ;;  %v385_v35 = vsel %vm1206_vm2, %v1036_v18, 0.0 }
 0x18d   :  { %994 = vmatmul.msk.f32.vlgmr.msrb.gmra.mxu3 %vm258_vm3, %v385_v35  ;;  %v421_v38 = vsel %vm258_vm3, %v385_v35, 0.0  ;;  %v384_v28 = vsel %vm1227_vm4, %v1038_v20, 0.0 }
 0x18e   :  { %1039 = vpow2.f32 %v377_v21  ;;  %422 = vadd.xlane.f32.xlu2 %v421_v38  ;;  %993 = vmatmul.msk.f32.gmra.mxu2 %vm258_vm3, %v384_v28  ;;  %v418_v43 = vsel %vm258_vm3, %v384_v28, 0.0  ;;  %v393_v21 = vld [vmem:[#allocation3 + $0x30] sm:$0xff] }
 0x18f   :  { %v401_v38 = vmul.f32 %v1330_v24, %v393_v21 }
 0x191   :  { %v333_v30 = vpop.permute.xlu1 %332 }
 0x192   :  { %v358_v42 = vsub.f32 %v1237_v31, %v333_v30 }
 0x194   :  { %v1040_v32 = vpop.eup %1039  ;;  %v369_v33 = vmul.f32 1.442695, %v358_v42 }
 0x195   :  { %v386_v19 = vsel %vm1227_vm4, %v1040_v32, 0.0 }
 0x196   :  { %1041 = vpow2.f32 %v369_v33  ;;  %407 = vadd.xlane.f32.xlu2 %v406_v34  ;;  %995 = vmatmul.msk.f32.gmra.mxu3 %vm258_vm3, %v386_v19  ;;  %v424_v36 = vsel %vm258_vm3, %v386_v19, 0.0  ;;  %v388_v33 = vld [vmem:[#allocation3 + $0x8] sm:$0xff]  ;;  %v394_v34 = vld [vmem:[#allocation3 + $0x38] sm:$0xff] }
 0x197   :  { %425 = vadd.xlane.f32.xlu1 %v424_v36  ;;  %1043 = vpow2.f32 %v313_v40 }
 0x198   :  { %1045 = vpow2.f32 %v301_v41 }
 0x199   :  { %1047 = vpow2.f32 %v309_v4  ;;  %v465_v12 = vpop.permute.xlu1 %464  ;;  %v450_v4 = vld [vmem:[#allocation4 + $0x30] sm:$0xff] }
 0x19a   :  { %1049 = vpow2.f32 %v305_v8  ;;  %v494_v44 = vmul.f32 %v465_v12, %v446_v25  ;;  %v390_v12 = vld [vmem:[#allocation3 + $0x18] sm:$0xff]  ;;  %v498_v14 = vmul.f32 %v1433_v48, %v450_v4 }
 0x19c   :  { %v1042_v37 = vpop.eup %1041 }
 0x19d   :  { %v382_v39 = vsel %vm1227_vm4, %v1042_v37, 0.0  ;;  %v1409_v27 = vpop.eup %1043 }
 0x19e   :  { %991 = vmatmul.msk.f32.gmra.mxu1 %vm258_vm3, %v382_v39  ;;  %v412_v31 = vsel %vm258_vm3, %v382_v39, 0.0  ;;  %v1412_v45 = vpop.eup %1045  ;;  %v402_v39 = vmul.f32 %v1409_v27, %v394_v34 }
 0x19f   :  { %413 = vadd.xlane.f32.xlu0 %v412_v31  ;;  %v1421_v9 = vpop.eup %1047  ;;  %v396_v36 = vmul.f32 %v1412_v45, %v388_v33 }
 0x1a0   :  { %v1424_v10 = vpop.eup %1049 }
 0x1a1   :  { %v475_v59 = vpop.permute.xlu1 %474 }
 0x1a2   :  { %v496_v56 = vmul.f32 %v475_v59, %v448_v51  ;;  %v392_v51 = vld [vmem:[#allocation3 + $0x28] sm:$0xff] }
 0x1a7   :  { %419 = vadd.xlane.f32.xlu0 %v418_v43 }
 0x1ae   :  { %489 = vperm.xlu2 %1013, %v1409_v27   ;;  %v398_v27 = vmul.f32 %v1424_v10, %v390_v12  ;;  %v734_v12 = vld [vmem:[%s1522_s5 + $0x18] sm:$0xff] }
 0x1af   :  { %845 = vmatpush.msra.mxu3 %v734_v12 }
 0x1b0   :  { %459 = vperm.xlu1 %1015, %v1412_v45  }
 0x1bb   :  { %479 = vperm.xlu0 %1014, %v1421_v9  }
 0x1c3   :  { %469 = vperm.xlu0 %1014, %v1424_v10   ;;  %v451_v10 = vld [vmem:[#allocation4 + $0x38] sm:$0xff] }
 0x1e1   :  { %v417_v61 = vpop.xlane.xlu0 %416 }
 0x1e2   :  { %v431_v7 = vadd.f32 %v417_v61, %v399_v55 }
 0x1e4   :  { %440 = vst.msk [vmem:[#allocation3 + $0x20] sm:$0xff] %vm41_vm1, %v431_v7 }
 0x1e9   :  { %v405_v49 = vpop.xlane.xlu1 %404 }
 0x1ea   :  { %v427_v29 = vadd.f32 %v405_v49, %v395_v47 }
 0x1eb   :  { %v647_v50 = vld [vmem:[#allocation3 + $0x20] sm:$0xff] }
 0x1ec   :  { %436 = vst.msk [vmem:[#allocation3] sm:$0xff] %vm41_vm1, %v427_v29  ;;  %vm655_vm5 = vcmp.gt.f32.partialorder %v647_v50, 0.0 }
 0x1ed   :  { %v663_v53 = vsel %vm655_vm5, %v647_v50, 1.0 }
 0x1ee   :  { %1051 = vrcp.f32 %v663_v53 }
 0x1ef   :  { %1053 = vpow2.f32 %v1004_v52 }
 0x1f0   :  { %v581_v57 = vpop.f32.mrf.mxu2 }
 0x1f1   :  { %v620_v60 = vadd.f32 %v581_v57, %v496_v56  ;;  %v411_v62 = vpop.xlane.xlu2 %410  ;;  %v400_v57 = vmul.f32 %v1421_v9, %v392_v51 }
 0x1f2   :  { %v429_v23 = vadd.f32 %v411_v62, %v397_v58  ;;  %v523_v0 = vpop.f32.mrf.mxu0 }
 0x1f3   :  { %628 = vst.msk [vmem:[#allocation4 + $0x20] sm:$0xff] %vm58_vm0, %v620_v60  ;;  %v616_v1 = vadd.f32 %v523_v0, %v492_v13  ;;  %v643_v2 = vld [vmem:[#allocation3] sm:$0xff] }
 0x1f4   :  { %v1052_v3 = vpop.eup %1051  ;;  %438 = vst.msk [vmem:[#allocation3 + $0x10] sm:$0xff] %vm41_vm1, %v429_v23  ;;  %vm651_vm6 = vcmp.gt.f32.partialorder %v643_v2, 0.0 }
 0x1f5   :  { %624 = vst.msk [vmem:[#allocation4] sm:$0xff] %vm58_vm0, %v616_v1  ;;  %705 = vperm.xlu2 %1013, %v1052_v3   ;;  %v659_v6 = vsel %vm651_vm6, %v643_v2, 1.0  ;;  %v1054_v11 = vpop.eup %1053  ;;  %v445_v2 = vld [vmem:[#allocation4 + $0x8] sm:$0xff] }
 0x1f6   :  { %1055 = vrcp.f32 %v659_v6  ;;  %v1440_v15 = vadd.f32 1.0, %v1054_v11 }
 0x1f8   :  { %1057 = vrcp.f32 %v1440_v15  ;;  %vm871_vm9 = vweird.f32 %v1440_v15  ;;  %v877_v59 = vand.u32 2147483648, %v1440_v15  ;;  %v875_v47 = vand.u32 2147483647, %v1440_v15 }
 0x1fa   :  { %v552_v16 = vpop.f32.mrf.mxu1  ;;  %v878_v26 = vor.u32 1.1754944e-38, %v877_v59  ;;  %vm876_vm14 = vcmp.eq.f32.partialorder %v875_v47, 8.507059e+37 }
 0x1fb   :  { %v618_v17 = vadd.f32 %v552_v16, %v494_v44  ;;  %v645_v18 = vld [vmem:[#allocation3 + $0x10] sm:$0xff] }
 0x1fc   :  { %v1056_v20 = vpop.eup %1055  ;;  %vm653_vm7 = vcmp.gt.f32.partialorder %v645_v18, 0.0 }
 0x1fd   :  { %626 = vst.msk [vmem:[#allocation4 + $0x10] sm:$0xff] %vm58_vm0, %v618_v17  ;;  %685 = vperm.xlu0 %1014, %v1056_v20   ;;  %v661_v35 = vsel %vm653_vm7, %v645_v18, 1.0  ;;  %v449_v18 = vld [vmem:[#allocation4 + $0x28] sm:$0xff] }
 0x1fe   :  { %1059 = vrcp.f32 %v661_v35  ;;  %v1058_v42 = vpop.eup %1057 }
 0x1ff   :  { %v867_v19 = vmul.f32 %v1058_v42, %v1440_v15  ;;  %vm872_vm10 = vweird.f32 %v1058_v42 }
 0x200   :  { %vm1457_vm12 = vmor %vm871_vm9, %vm872_vm10 }
 0x201   :  { %v423_v28 = vpop.xlane.xlu2 %422  ;;  %v868_v43 = vsub.f32 1.0, %v867_v19 }
 0x202   :  { %v433_v30 = vadd.f32 %v423_v28, %v401_v38  ;;  %v526_v44 = vpop.f32.mrf.mxu0 }
 0x203   :  { %v869_v45 = vmul.f32 %v1058_v42, %v868_v43 }
 0x204   :  { %v1060_v32 = vpop.eup %1059  ;;  %442 = vst.msk [vmem:[#allocation3 + $0x30] sm:$0xff] %vm41_vm1, %v433_v30  ;;  %v677_v43 = vld [vmem:[#allocation4 + $0x10] sm:$0xff] }
 0x205   :  { %695 = vperm.xlu2 %1013, %v1060_v32   ;;  %v870_v46 = vadd.f32 %v1058_v42, %v869_v45  ;;  %v447_v32 = vld [vmem:[#allocation4 + $0x18] sm:$0xff] }
 0x207   :  { %v874_v53 = vsel %vm1457_vm12, %v1058_v42, %v870_v46  ;;  %v733_v42 = vld [vmem:[%s1522_s5 + $0x10] sm:$0xff] }
 0x208   :  { %v879_v60 = vsel %vm876_vm14, %v878_v26, %v874_v53  ;;  %814 = vmatpush.msra.mxu2 %v733_v42 }
 0x209   :  { %v408_v37 = vpop.xlane.xlu2 %407  ;;  %v891_v1 = vsub.f32 1.0, %v879_v60  ;;  %v882_v11 = vperm.slane %v879_v60, 0  ;;  %v889_v60 = vld [vmem:[%s1524_s4] sm:$0xff] }
 0x20a   :  { %v428_v31 = vadd.f32 %v408_v37, %v396_v36  ;;  %v426_v40 = vpop.xlane.xlu1 %425 }
 0x20b   :  { %v434_v41 = vadd.f32 %v426_v40, %v402_v39  ;;  %v649_v24 = vld [vmem:[#allocation3 + $0x30] sm:$0xff]  ;;  %v893_v3 = vperm.slane %v891_v1, 0  ;;  %v732_v39 = vld [vmem:[%s1522_s5 + $0x8] sm:$0xff] }
 0x20c   :  { %437 = vst.msk [vmem:[#allocation3 + $0x8] sm:$0xff] %vm41_vm1, %v428_v31  ;;  %vm657_vm8 = vcmp.gt.f32.partialorder %v649_v24, 0.0  ;;  %756 = vmatpush.msra.mxu0 %v732_v39  ;;  %v679_v31 = vld [vmem:[#allocation4 + $0x20] sm:$0xff] }
 0x20d   :  { %443 = vst.msk [vmem:[#allocation3 + $0x38] sm:$0xff] %vm41_vm1, %v434_v41  ;;  %v665_v8 = vsel %vm657_vm8, %v649_v24, 1.0  ;;  %v731_v24 = vld [vmem:[%s1522_s5] sm:$0xff] }
 0x20e   :  { %1061 = vrcp.f32 %v665_v8  ;;  %785 = vmatpush.msra.mxu1 %v731_v24 }
 0x210   :  { %v610_v63 = vpop.f32.mrf.mxu3 }
 0x211   :  { %v622_v5 = vadd.f32 %v610_v63, %v498_v14  ;;  %v490_v29 = vpop.permute.xlu2 %489  ;;  %v584_v28 = vpop.f32.mrf.mxu2  ;;  %v675_v14 = vld [vmem:[#allocation4] sm:$0xff] }
 0x212   :  { %v414_v55 = vpop.xlane.xlu0 %413  ;;  %v499_v54 = vmul.f32 %v490_v29, %v451_v10 }
 0x213   :  { %630 = vst.msk [vmem:[#allocation4 + $0x30] sm:$0xff] %vm58_vm0, %v622_v5  ;;  %v430_v61 = vadd.f32 %v414_v55, %v398_v27  ;;  %v644_v7 = vld [vmem:[#allocation3 + $0x8] sm:$0xff] }
 0x214   :  { %v1062_v49 = vpop.eup %1061  ;;  %vm652_vm11 = vcmp.gt.f32.partialorder %v644_v7, 0.0  ;;  %v650_v48 = vld [vmem:[#allocation3 + $0x38] sm:$0xff] }
 0x215   :  { %439 = vst.msk [vmem:[#allocation3 + $0x18] sm:$0xff] %vm41_vm1, %v430_v61  ;;  %715 = vperm.xlu1 %1015, %v1062_v49   ;;  %v660_v50 = vsel %vm652_vm11, %v644_v7, 1.0  ;;  %vm658_vm13 = vcmp.gt.f32.partialorder %v650_v48, 0.0 }
 0x216   :  { %1063 = vrcp.f32 %v660_v50  ;;  %v666_v52 = vsel %vm658_vm13, %v650_v48, 1.0 }
 0x217   :  { %1065 = vrcp.f32 %v666_v52 }
 0x219   :  { %v613_v56 = vpop.f32.mrf.mxu3 }
 0x21a   :  { %v623_v58 = vadd.f32 %v613_v56, %v499_v54  ;;  %v420_v13 = vpop.xlane.xlu0 %419  ;;  %v681_v59 = vld [vmem:[#allocation4 + $0x30] sm:$0xff] }
 0x21b   :  { %v432_v62 = vadd.f32 %v420_v13, %v400_v57  ;;  %v555_v36 = vpop.f32.mrf.mxu1  ;;  %v1016_v57 = vld [vmem:[%s1523_s6] ss:$0 sm:$0xff] }
 0x21c   :  { %v1064_v23 = vpop.eup %1063  ;;  %631 = vst.msk [vmem:[#allocation4 + $0x38] sm:$0xff] %vm58_vm0, %v623_v58  ;;  %v646_v17 = vld [vmem:[#allocation3 + $0x18] sm:$0xff] }
 0x21d   :  { %v1066_v0 = vpop.eup %1065  ;;  %441 = vst.msk [vmem:[#allocation3 + $0x28] sm:$0xff] %vm41_vm1, %v432_v62  ;;  %690 = vperm.xlu2 %1013, %v1064_v23   ;;  %vm654_vm1 = vcmp.gt.f32.partialorder %v646_v17, 0.0 }
 0x21e   :  { %720 = vperm.xlu0 %1014, %v1066_v0   ;;  %v662_v20 = vsel %vm654_vm1, %v646_v17, 1.0 }
 0x222   :  { %v460_v6 = vpop.permute.xlu1 %459 }
 0x223   :  { %v493_v25 = vmul.f32 %v460_v6, %v445_v2  ;;  %v682_v46 = vld [vmem:[#allocation4 + $0x38] sm:$0xff] }
 0x224   :  { %v648_v9 = vld [vmem:[#allocation3 + $0x28] sm:$0xff] }
 0x225   :  { %v617_v15 = vadd.f32 %v526_v44, %v493_v25  ;;  %895 = vperm.xlu2 %1013, %v893_v3   ;;  %vm656_vm15 = vcmp.gt.f32.partialorder %v648_v9, 0.0 }
 0x226   :  { %884 = vperm.xlu0 %1014, %v882_v11   ;;  %v664_v16 = vsel %vm656_vm15, %v648_v9, 1.0 }
 0x227   :  { %625 = vst.msk [vmem:[#allocation4 + $0x8] sm:$0xff] %vm58_vm0, %v617_v15  ;;  %1067 = vrcp.f32 %v664_v16 }
 0x228   :  { %1069 = vrcp.f32 %v662_v20 }
 0x22d   :  { %v1068_v21 = vpop.eup %1067  ;;  %v480_v35 = vpop.permute.xlu0 %479 }
 0x22e   :  { %v497_v38 = vmul.f32 %v480_v35, %v449_v18  ;;  %710 = vperm.xlu1 %1015, %v1068_v21   ;;  %v1070_v33 = vpop.eup %1069  ;;  %v676_v5 = vld [vmem:[#allocation4 + $0x8] sm:$0xff] }
 0x22f   :  { %v890_v18 = vld [vmem:[%s1524_s4 + $0x8] sm:$0xff] }
 0x230   :  { %v621_v30 = vadd.f32 %v584_v28, %v497_v38 }
 0x232   :  { %629 = vst.msk [vmem:[#allocation4 + $0x28] sm:$0xff] %vm58_vm0, %v621_v30  ;;  %v1080_v30 = vmov 32.0  }
 0x233   :  { %1071 = vrcp.f32 %v1080_v30 }
 0x235   :  { %v470_v34 = vpop.permute.xlu0 %469 }
 0x236   :  { %v495_v19 = vmul.f32 %v470_v34, %v447_v32  ;;  %700 = vperm.xlu1 %1015, %v1070_v33  }
 0x238   :  { %v619_v37 = vadd.f32 %v555_v36, %v495_v19 }
 0x239   :  { %v680_v22 = vld [vmem:[#allocation4 + $0x28] sm:$0xff]  ;;  %v1072_v42 = vpop.eup %1071 }
 0x23a   :  { %627 = vst.msk [vmem:[#allocation4 + $0x18] sm:$0xff] %vm58_vm0, %v619_v37  ;;  %v910_v32 = vmul.f32 32.0, %v1072_v42  ;;  %vm914_vm2 = vweird.f32 %v1072_v42 }
 0x23c   :  { %v911_v33 = vsub.f32 1.0, %v910_v32 }
 0x23e   :  { %v912_v34 = vmul.f32 %v1072_v42, %v911_v33 }
 0x240   :  { %v913_v19 = vadd.f32 %v1072_v42, %v912_v34 }
 0x241   :  { %v678_v50 = vld [vmem:[#allocation4 + $0x18] sm:$0xff] }
 0x242   :  { %v915_v36 = vsel %vm914_vm2, %v1072_v42, %v913_v19 }
 0x24f   :  { %v706_v40 = vpop.permute.xlu2 %705 }
 0x250   :  { %v727_v41 = vmul.f32 %v706_v40, %v679_v31 }
 0x252   :  { %1000 = vmatmul.msk.f32.vlgmr.msra.gmra.mxu2 %vm58_vm0, %v727_v41 }
 0x25f   :  { %v696_v4 = vpop.permute.xlu2 %695 }
 0x260   :  { %v725_v8 = vmul.f32 %v696_v4, %v677_v43 }
 0x262   :  { %996 = vmatmul.msk.f32.vlgmr.msra.gmra.mxu0 %vm58_vm0, %v725_v8 }
 0x26f   :  { %v686_v45 = vpop.permute.xlu0 %685 }
 0x270   :  { %v723_v63 = vmul.f32 %v686_v45, %v675_v14 }
 0x272   :  { %998 = vmatmul.msk.f32.vlgmr.msra.gmra.mxu1 %vm58_vm0, %v723_v63 }
 0x277   :  { %v691_v27 = vpop.permute.xlu2 %690 }
 0x278   :  { %v724_v55 = vmul.f32 %v691_v27, %v676_v5 }
 0x27a   :  { %999 = vmatmul.msk.f32.gmra.mxu1 %vm58_vm0, %v724_v55 }
 0x27f   :  { %v896_v62 = vpop.permute.xlu2 %895 }
 0x280   :  { %v898_v1 = vmul.f32 %v896_v62, %v889_v60  ;;  %v899_v21 = vmul.f32 %v896_v62, %v890_v18 }
 0x287   :  { %v716_v61 = vpop.permute.xlu1 %715 }
 0x288   :  { %v729_v7 = vmul.f32 %v716_v61, %v681_v59 }
 0x28a   :  { %1002 = vmatmul.msk.f32.vlgmr.msra.gmra.mxu3 %vm58_vm0, %v729_v7 }
 0x290   :  { %v721_v47 = vpop.permute.xlu0 %720 }
 0x291   :  { %v730_v49 = vmul.f32 %v721_v47, %v682_v46  ;;  %v1017_v46 = vld [vmem:[%s1525_s8] ss:$0 sm:$0xff] }
 0x293   :  { %1003 = vmatmul.msk.f32.gmra.mxu3 %vm58_vm0, %v730_v49  ;;  %v1018_v49 = vld [vmem:[%s1526_s9] ss:$0 sm:$0xff] }
 0x298   :  { %v885_v0 = vpop.permute.xlu0 %884 }
 0x2a0   :  { %v711_v48 = vpop.permute.xlu1 %710 }
 0x2a1   :  { %v728_v10 = vmul.f32 %v711_v48, %v680_v22 }
 0x2a3   :  { %1001 = vmatmul.msk.f32.gmra.mxu2 %vm58_vm0, %v728_v10 }
 0x2a8   :  { %v701_v29 = vpop.permute.xlu1 %700 }
 0x2a9   :  { %v726_v51 = vmul.f32 %v701_v29, %v678_v50 }
 0x2ab   :  { %997 = vmatmul.msk.f32.gmra.mxu0 %vm58_vm0, %v726_v51  ;;  %vm902_vm0 = vcmask 261120  }
 0x2d5   :  { %v816_v54 = vpop.f32.mrf.mxu2 }
 0x2df   :  { %v758_v26 = vpop.f32.mrf.mxu0 }
 0x2ef   :  { %v787_v52 = vpop.f32.mrf.mxu1 }
 0x2f0   :  { %v788_v53 = vadd.f32 %v787_v52, %v758_v26 }
 0x2f2   :  { %v822_v56 = vadd.f32 %v816_v54, %v788_v53 }
 0x2f7   :  { %v790_v11 = vpop.f32.mrf.mxu1 }
 0x30d   :  { %v847_v58 = vpop.f32.mrf.mxu3 }
 0x30e   :  { %v853_v13 = vadd.f32 %v847_v58, %v822_v56 }
 0x310   :  { %v859_v23 = vadd.f32 %v1016_v57, %v853_v13 }
 0x312   :  { %v887_v2 = vmul.f32 %v885_v0, %v859_v23 }
 0x314   :  { %v900_v3 = vadd.f32 %v898_v1, %v887_v2 }
 0x316   :  { %v903_v6 = vsel %vm902_vm0, %v900_v3, 0.0  ;;  %v850_v16 = vpop.f32.mrf.mxu3 }
 0x317   :  { %904 = vadd.xlane.f32.xlu1 %v903_v6 }
 0x326   :  { %v819_v9 = vpop.f32.mrf.mxu2 }
 0x328   :  { %v761_v25 = vpop.f32.mrf.mxu0 }
 0x329   :  { %v791_v44 = vadd.f32 %v790_v11, %v761_v25 }
 0x32b   :  { %v823_v15 = vadd.f32 %v819_v9, %v791_v44 }
 0x32d   :  { %v854_v17 = vadd.f32 %v850_v16, %v823_v15 }
 0x32f   :  { %v860_v20 = vadd.f32 %v1016_v57, %v854_v17 }
 0x331   :  { %v888_v35 = vmul.f32 %v885_v0, %v860_v20 }
 0x333   :  { %v901_v38 = vadd.f32 %v899_v21, %v888_v35 }
 0x335   :  { %v906_v28 = vsel %vm902_vm0, %v901_v38, 0.0 }
 0x336   :  { %907 = vadd.xlane.f32.xlu0 %v906_v28 }
 0x38a   :  { %v905_v37 = vpop.xlane.xlu1 %904 }
 0x38b   :  { %v916_v39 = vmul.f32 %v915_v36, %v905_v37 }
 0x38d   :  { %v918_v31 = vsub.f32 %v900_v3, %v916_v39 }
 0x38f   :  { %v920_v40 = vmul.f32 %v918_v31, %v918_v31 }
 0x391   :  { %v922_v41 = vsel %vm902_vm0, %v920_v40, 0.0 }
 0x392   :  { %923 = vadd.xlane.f32.xlu2 %v922_v41 }
 0x3a9   :  { %v908_v24 = vpop.xlane.xlu0 %907 }
 0x3aa   :  { %v917_v43 = vmul.f32 %v915_v36, %v908_v24 }
 0x3ac   :  { %v919_v4 = vsub.f32 %v901_v38, %v917_v43 }
 0x3ae   :  { %v921_v8 = vmul.f32 %v919_v4, %v919_v4 }
 0x3b0   :  { %v925_v12 = vsel %vm902_vm0, %v921_v8, 0.0 }
 0x3b1   :  { %926 = vadd.xlane.f32.xlu1 %v925_v12 }
 0x405   :  { %v924_v14 = vpop.xlane.xlu2 %923 }
 0x406   :  { %v928_v45 = vmul.f32 %v924_v14, %v915_v36 }
 0x408   :  { %v930_v63 = vadd.f32 1e-05, %v928_v45 }
 0x40a   :  { %1073 = vrsqrt.f32 %v930_v63  ;;  %vm938_vm4 = vweird.f32 %v930_v63 }
 0x410   :  { %v1074_v5 = vpop.eup %1073 }
 0x411   :  { %v933_v27 = vmul.f32 %v1074_v5, %v930_v63  ;;  %vm939_vm3 = vweird.f32 %v1074_v5 }
 0x412   :  { %vm940_vm5 = vmor %vm938_vm4, %vm939_vm3 }
 0x413   :  { %v934_v55 = vmul.f32 %v1074_v5, %v933_v27 }
 0x415   :  { %v935_v59 = vmul.f32 0.5, %v934_v55 }
 0x417   :  { %v936_v61 = vsub.f32 1.5, %v935_v59 }
 0x419   :  { %v937_v7 = vmul.f32 %v1074_v5, %v936_v61 }
 0x41b   :  { %v941_v47 = vsel %vm940_vm5, %v1074_v5, %v937_v7 }
 0x41c   :  { %v952_v48 = vmul.f32 %v941_v47, %v918_v31 }
 0x41e   :  { %v958_v22 = vmul.f32 %v1017_v46, %v952_v48 }
 0x420   :  { %v964_v10 = vadd.f32 %v1018_v49, %v958_v22 }
 0x422   :  { %966 = vst.msk [vmem:[%s1527_s10] sm:$0xff] %vm902_vm0, %v964_v10 }
 0x424   :  { %v927_v29 = vpop.xlane.xlu1 %926 }
 0x425   :  { %v929_v50 = vmul.f32 %v927_v29, %v915_v36 }
 0x427   :  { %v931_v51 = vadd.f32 1e-05, %v929_v50 }
 0x429   :  { %1075 = vrsqrt.f32 %v931_v51  ;;  %vm948_vm7 = vweird.f32 %v931_v51 }
 0x42f   :  { %v1076_v52 = vpop.eup %1075 }
 0x430   :  { %v943_v26 = vmul.f32 %v1076_v52, %v931_v51  ;;  %vm949_vm6 = vweird.f32 %v1076_v52 }
 0x431   :  { %vm950_vm8 = vmor %vm948_vm7, %vm949_vm6 }
 0x432   :  { %v944_v53 = vmul.f32 %v1076_v52, %v943_v26 }
 0x434   :  { %v945_v54 = vmul.f32 0.5, %v944_v53 }
 0x436   :  { %v946_v56 = vsub.f32 1.5, %v945_v54 }
 0x438   :  { %v947_v57 = vmul.f32 %v1076_v52, %v946_v56 }
 0x43a   :  { %v951_v58 = vsel %vm950_vm8, %v1076_v52, %v947_v57 }
 0x43b   :  { %v953_v13 = vmul.f32 %v951_v58, %v919_v4 }
 0x43d   :  { %v959_v60 = vmul.f32 %v1017_v46, %v953_v13 }
 0x43f   :  { %v965_v62 = vadd.f32 %v1018_v49, %v959_v60 }
 0x441   :  { %967 = vst.msk [vmem:[%s1527_s10 + $0x8] sm:$0xff] %vm902_vm0, %v965_v62 }

</bundles_post_ra>
